<compile_context>
chip_gen: v7x
topology: tpu7x:2x2x1
jax: 0.10.0
libtpu: 0.0.40
codegen_flags: <defaults>
</compile_context>

<pallas_src>
import numpy as np
import jax
import jax.numpy as jnp
from jax.experimental import pallas as pl
from jax.experimental.pallas import tpu as pltpu

# -------- small, module-consistent shapes --------
K_W, K_H = 8, 4                  # k_w, k_h  (d_embd = k_w * k_h)
D_EMBD = K_W * K_H               # 32
OUT_CH = 4                       # output_channel == num_filt
NUM_REL = 8
NUM_ENT = 256
BATCH = 8                        # one full sublane group per review
H = 2 * K_W                      # conv spatial rows (16)
W = K_H                          # conv spatial cols (4)
HW = H * W                       # 64
FLAT = OUT_CH * HW               # flat_sz = 2*k_w*k_h*out_channel (256)
N_TAP = 9                        # 3x3 conv taps
BN_EPS = 1e-5


def interleave_chessboard(kw, kh):
    """Exact port of Rel_InteractE.interleave_tensors_chessboard."""
    A = np.arange(kw * kh).reshape(kh, kw)
    B = np.arange(kw * kh, 2 * kw * kh).reshape(kh, kw)
    res = np.zeros((2 * kw, kh), dtype=np.int64)
    for i in range(kh):
        if i % 2 == 0:
            res[0::2, i] = A[i, :]
            res[1::2, i] = B[i, :]
        else:
            res[0::2, i] = B[i, :]
            res[1::2, i] = A[i, :]
    return jnp.asarray(res.T.reshape(-1), dtype=jnp.int32)


CHEQUER_PERM = interleave_chessboard(K_W, K_H)


# ============================ fused Pallas kernel =========================

def _rel_interacte_kernel(src_ref, wfc_ref, shift_ref, nfT_ref, bias_ref,
                          out_ref):
    # src_ref  : (N_TAP+1, 2, B, FLAT)  lane-dense conv operands
    #            src[t, 0] = im2col patch plane for tap t, tiled over channels
    #            src[t, 1] = per-sample filter tap, pre-scaled by conv.bn∘bn1
    #            src[9]    = (ones, fused bn shift) -> conv emerges fully bn'd
    # wfc_ref  : (FLAT, D)      fc weight with bn2 scale folded into columns
    # shift_ref: (1, D)         b_fc * bn2_scale + bn2_shift
    # nfT_ref  : (D, NUM_ENT)   entity embeddings, transposed
    # bias_ref : (1, NUM_ENT)   per-entity bias
    # out_ref  : (B, NUM_ENT)   scores (lane- and sublane-dense store)

    # (1)+(2) grouped relation-conditioned 3x3 "same" conv + fused
    #         conv.bn ∘ bn1 + ReLU, as 10 lane-dense VPU FMAs on (B, FLAT)
    #         tiles (VPU slots are otherwise idle; feature_drop = identity).
    conv = src_ref[0, 0] * src_ref[0, 1]
    for t in range(1, N_TAP + 1):                              # unrolled
        conv = conv + src_ref[t, 0] * src_ref[t, 1]
    y = jnp.maximum(conv, 0.0)                                 # (B, FLAT)

    # (3)+(4) fc (+ bn2 folded) + ReLU: one K=FLAT MXU dot; hidden_drop = id.
    h = (jnp.dot(y, wfc_ref[...], preferred_element_type=jnp.float32)
         + shift_ref[...])                                     # (B, D)
    h = jnp.maximum(h, 0.0)

    # (5) entity scores: h @ n_feats^T + bias, lane-dense (B, NUM_ENT) store.
    out_ref[...] = (jnp.dot(h, nfT_ref[...],
                            preferred_element_type=jnp.float32)
                    + bias_ref[...])


def _fused_call(src, wfc, shift, nfT, bias):
    def full(shape):
        return pl.BlockSpec(shape, lambda i, _n=len(shape): (0,) * _n)

    return pl.pallas_call(
        _rel_interacte_kernel,
        out_shape=jax.ShapeDtypeStruct((BATCH, NUM_ENT), jnp.float32),
        grid=(1,),
        in_specs=[full(src.shape), full(wfc.shape), full(shift.shape),
                  full(nfT.shape), full(bias.shape)],
        out_specs=full((BATCH, NUM_ENT)),
        compiler_params=pltpu.CompilerParams(
            dimension_semantics=("arbitrary",)),
    )(src, wfc, shift, nfT, bias)


# ============================ full forward ===============================

def _build_operands(params, n_feats, r_feats, sub, rel):
    # Host-side glue (pure indexing + tiny affine folds): embedding gathers,
    # chequer permutation, bn0, im2col patch extraction, BN-affine folding.
    sub_emb = n_feats[sub]                                     # (B, d)
    rel_emb = r_feats[rel]                                     # (B, d)
    comb = jnp.concatenate([sub_emb, rel_emb], axis=1)         # (B, 2d)
    x = comb[:, CHEQUER_PERM].reshape(BATCH, H, W)             # (B, 2*k_w, k_h)
    x = x * params["bn0_scale"] + params["bn0_shift"]          # bn0 (inference)
    xp = jnp.pad(x, ((0, 0), (1, 1), (1, 1)))                  # "same" 3x3 pad

    # im2col patches, tap-major: patches[t, b, hw] = xp[b, i+di, j+dj], t=di*3+dj
    patches = jnp.stack(
        [xp[:, di:di + H, dj:dj + W].reshape(BATCH, HW)
         for di in range(3) for dj in range(3)], axis=0)       # (9, B, HW)
    # Tile over output channels -> lane-dense columns ordered c*HW + hw.
    pw = jnp.tile(patches, (1, 1, OUT_CH))                     # (9, B, FLAT)

    # Per-sample filter taps with the fused conv.bn ∘ bn1 scale folded in.
    filt = params["filter_emb"][rel].reshape(BATCH, OUT_CH, N_TAP)
    filt = filt * params["ch_scale"][None, :, None]
    fw = jnp.repeat(jnp.transpose(filt, (2, 0, 1)), HW, axis=2)  # (9, B, FLAT)

    # 10th "tap" carries the fused bn shift (ones * shift) so the FMA sum
    # yields the conv already batch-normalised.
    ones_pl = jnp.ones((1, BATCH, FLAT), jnp.float32)
    shift_pl = jnp.broadcast_to(
        jnp.repeat(params["ch_shift"], HW)[None, None, :], (1, BATCH, FLAT))
    src = jnp.stack([jnp.concatenate([pw, ones_pl], axis=0),
                     jnp.concatenate([fw, shift_pl], axis=0)],
                    axis=1)                                    # (10, 2, B, FLAT)

    # fc weight / bias with bn2 (inference affine) folded in.
    wfc = params["w_fc_t"] * params["bn2_scale"]               # (FLAT, D)
    shift = params["b_fc"] * params["bn2_scale"] + params["bn2_shift"]  # (1, D)

    return src, wfc, shift, params["n_feats_t"], params["ent_bias"]


def rel_interacte_forward(params, n_feats, r_feats, sub, rel):
    return _fused_call(*_build_operands(params, n_feats, r_feats, sub, rel))


# ====================== pure-JAX reference (check) =======================

def reference_forward(params, n_feats, r_feats, sub, rel):
    hi = jax.lax.Precision.HIGHEST      # keep reference matmuls in true f32
    sub_emb = n_feats[sub]
    rel_emb = r_feats[rel]
    comb = jnp.concatenate([sub_emb, rel_emb], axis=1)
    x = comb[:, CHEQUER_PERM].reshape(BATCH, H, W)
    x = x * params["bn0_scale"] + params["bn0_shift"]
    f = params["filter_emb"][rel].reshape(BATCH, OUT_CH, 3, 3)
    xp = jnp.pad(x, ((0, 0), (1, 1), (1, 1)))
    out = jnp.zeros((BATCH, OUT_CH, H, W), jnp.float32)
    for di in range(3):
        for dj in range(3):
            out = out + (f[:, :, di, dj][:, :, None, None]
                         * xp[:, di:di + H, dj:dj + W][:, None, :, :])
    out = (out * params["ch_scale"][None, :, None, None]
           + params["ch_shift"][None, :, None, None])
    out = jnp.maximum(out, 0.0)
    h = (jnp.dot(out.reshape(BATCH, FLAT), params["w_fc_t"], precision=hi)
         + params["b_fc"])
    h = h * params["bn2_scale"] + params["bn2_shift"]
    h = jnp.maximum(h, 0.0)
    return jnp.dot(h, params["n_feats_t"], precision=hi) + params["ent_bias"]


# ================================ main ===================================

if __name__ == "__main__":
    key = jax.random.PRNGKey(0)
    keys = jax.random.split(key, 16)

    n_feats = jax.random.normal(keys[0], (NUM_ENT, D_EMBD), jnp.float32) * 0.5
    r_feats = jax.random.normal(keys[1], (NUM_REL, D_EMBD), jnp.float32) * 0.5
    sub = jnp.array([3, 17, 42, 7, 101, 230, 0, 55], dtype=jnp.int32)
    rel = jnp.array([1, 5, 0, 7, 3, 2, 6, 4], dtype=jnp.int32)

    # Conv_with_Kernel.filter: Embedding(num_rel, in_c*out_c*3*3), xavier-normal
    filt_std = float(np.sqrt(2.0 / (NUM_REL + OUT_CH * 9)))
    filter_emb = (jax.random.normal(keys[2], (NUM_REL, OUT_CH * 9), jnp.float32)
                  * filt_std)

    # fc: Linear(flat_sz, d_embd)
    w_fc = (jax.random.normal(keys[3], (D_EMBD, FLAT), jnp.float32)
            * float(np.sqrt(1.0 / FLAT)))
    b_fc = jax.random.normal(keys[4], (D_EMBD,), jnp.float32) * 0.01

    # bias: nn.Parameter(zeros(num_ent)); small random values so the add-path
    # is exercised non-trivially (synthetic init).
    ent_bias = jax.random.normal(keys[5], (NUM_ENT,), jnp.float32) * 0.01

    # BatchNorm parameters (inference mode): gamma, beta, running mean/var,
    # folded into per-channel scale/shift.
    def bn_affine(k, n):
        k1, k2, k3, k4 = jax.random.split(k, 4)
        gamma = 1.0 + 0.1 * jax.random.normal(k1, (n,), jnp.float32)
        beta = 0.1 * jax.random.normal(k2, (n,), jnp.float32)
        rmean = 0.1 * jax.random.normal(k3, (n,), jnp.float32)
        rvar = 0.5 + jax.random.uniform(k4, (n,), jnp.float32)
        s = gamma / jnp.sqrt(rvar + BN_EPS)
        return s, beta - rmean * s

    s0, t0 = bn_affine(keys[6], 1)              # bn0 (1 channel)
    sA, tA = bn_affine(keys[7], OUT_CH)         # Conv_with_Kernel.bn
    sB, tB = bn_affine(keys[8], OUT_CH)         # bn1
    ch_scale = sA * sB                          # conv.bn then bn1 (no ReLU between)
    ch_shift = tA * sB + tB
    s2, t2 = bn_affine(keys[9], D_EMBD)         # bn2 (BatchNorm1d)

    params = dict(
        filter_emb=filter_emb,
        bn0_scale=s0[0], bn0_shift=t0[0],
        ch_scale=ch_scale, ch_shift=ch_shift,
        w_fc_t=w_fc.T, b_fc=b_fc.reshape(1, D_EMBD),
        bn2_scale=s2.reshape(1, D_EMBD), bn2_shift=t2.reshape(1, D_EMBD),
        n_feats_t=n_feats.T, ent_bias=ent_bias.reshape(1, NUM_ENT),
    )

    fwd = jax.jit(rel_interacte_forward)
    out = fwd(params, n_feats, r_feats, sub, rel)
    out = jax.block_until_ready(out)

    ref = reference_forward(params, n_feats, r_feats, sub, rel)
    np.testing.assert_allclose(np.asarray(out), np.asarray(ref),
                               rtol=1e-5, atol=1e-5)
    assert out.shape == (BATCH, NUM_ENT) and out.dtype == jnp.float32

    print("KERNEL_OK")
</pallas_src>

<mosaic_0001>
module attributes {stable_mosaic.version = 11 : i64} {
  func.func @_rel_interacte_kernel(%arg0: i32, %arg1: memref<10x2x8x256xf32, #tpu.memory_space<vmem>>, %arg2: memref<256x32xf32, #tpu.memory_space<vmem>>, %arg3: memref<1x32xf32, #tpu.memory_space<vmem>>, %arg4: memref<32x256xf32, #tpu.memory_space<vmem>>, %arg5: memref<1x256xf32, #tpu.memory_space<vmem>>, %arg6: memref<8x256xf32, #tpu.memory_space<vmem>>) attributes {dimension_semantics = [#tpu.dimension_semantics<arbitrary>], iteration_bounds = array<i64: 1>, scalar_prefetch = 0 : i64, scratch_operands = 0 : i64, tpu.core_type = #tpu.core_type<tc>, window_params = [{pipeline_mode = #tpu.pipeline_mode<synchronous>, transform_indices = @transform_0, window_bounds = array<i64: 10, 2, 8, 256>}, {pipeline_mode = #tpu.pipeline_mode<synchronous>, transform_indices = @transform_1, window_bounds = array<i64: 256, 32>}, {pipeline_mode = #tpu.pipeline_mode<synchronous>, transform_indices = @transform_2, window_bounds = array<i64: 1, 32>}, {pipeline_mode = #tpu.pipeline_mode<synchronous>, transform_indices = @transform_3, window_bounds = array<i64: 32, 256>}, {pipeline_mode = #tpu.pipeline_mode<synchronous>, transform_indices = @transform_4, window_bounds = array<i64: 1, 256>}, {pipeline_mode = #tpu.pipeline_mode<synchronous>, transform_indices = @transform_5, window_bounds = array<i64: 8, 256>}]} {
    %c0 = arith.constant 0 : index
    %c0_0 = arith.constant 0 : index
    %c0_1 = arith.constant 0 : index
    %c0_2 = arith.constant 0 : index
    %0 = vector.load %arg1[%c0, %c0_0, %c0_1, %c0_2] : memref<10x2x8x256xf32, #tpu.memory_space<vmem>>, vector<1x1x8x256xf32>
    %1 = vector.shape_cast %0 : vector<1x1x8x256xf32> to vector<8x256xf32>
    %c0_3 = arith.constant 0 : index
    %c1 = arith.constant 1 : index
    %c0_4 = arith.constant 0 : index
    %c0_5 = arith.constant 0 : index
    %2 = vector.load %arg1[%c0_3, %c1, %c0_4, %c0_5] : memref<10x2x8x256xf32, #tpu.memory_space<vmem>>, vector<1x1x8x256xf32>
    %3 = vector.shape_cast %2 : vector<1x1x8x256xf32> to vector<8x256xf32>
    %4 = arith.mulf %1, %3 : vector<8x256xf32>
    %c1_6 = arith.constant 1 : index
    %c0_7 = arith.constant 0 : index
    %c0_8 = arith.constant 0 : index
    %c0_9 = arith.constant 0 : index
    %5 = vector.load %arg1[%c1_6, %c0_7, %c0_8, %c0_9] : memref<10x2x8x256xf32, #tpu.memory_space<vmem>>, vector<1x1x8x256xf32>
    %6 = vector.shape_cast %5 : vector<1x1x8x256xf32> to vector<8x256xf32>
    %c1_10 = arith.constant 1 : index
    %c1_11 = arith.constant 1 : index
    %c0_12 = arith.constant 0 : index
    %c0_13 = arith.constant 0 : index
    %7 = vector.load %arg1[%c1_10, %c1_11, %c0_12, %c0_13] : memref<10x2x8x256xf32, #tpu.memory_space<vmem>>, vector<1x1x8x256xf32>
    %8 = vector.shape_cast %7 : vector<1x1x8x256xf32> to vector<8x256xf32>
    %9 = arith.mulf %6, %8 : vector<8x256xf32>
    %10 = arith.addf %4, %9 : vector<8x256xf32>
    %c2 = arith.constant 2 : index
    %c0_14 = arith.constant 0 : index
    %c0_15 = arith.constant 0 : index
    %c0_16 = arith.constant 0 : index
    %11 = vector.load %arg1[%c2, %c0_14, %c0_15, %c0_16] : memref<10x2x8x256xf32, #tpu.memory_space<vmem>>, vector<1x1x8x256xf32>
    %12 = vector.shape_cast %11 : vector<1x1x8x256xf32> to vector<8x256xf32>
    %c2_17 = arith.constant 2 : index
    %c1_18 = arith.constant 1 : index
    %c0_19 = arith.constant 0 : index
    %c0_20 = arith.constant 0 : index
    %13 = vector.load %arg1[%c2_17, %c1_18, %c0_19, %c0_20] : memref<10x2x8x256xf32, #tpu.memory_space<vmem>>, vector<1x1x8x256xf32>
    %14 = vector.shape_cast %13 : vector<1x1x8x256xf32> to vector<8x256xf32>
    %15 = arith.mulf %12, %14 : vector<8x256xf32>
    %16 = arith.addf %10, %15 : vector<8x256xf32>
    %c3 = arith.constant 3 : index
    %c0_21 = arith.constant 0 : index
    %c0_22 = arith.constant 0 : index
    %c0_23 = arith.constant 0 : index
    %17 = vector.load %arg1[%c3, %c0_21, %c0_22, %c0_23] : memref<10x2x8x256xf32, #tpu.memory_space<vmem>>, vector<1x1x8x256xf32>
    %18 = vector.shape_cast %17 : vector<1x1x8x256xf32> to vector<8x256xf32>
    %c3_24 = arith.constant 3 : index
    %c1_25 = arith.constant 1 : index
    %c0_26 = arith.constant 0 : index
    %c0_27 = arith.constant 0 : index
    %19 = vector.load %arg1[%c3_24, %c1_25, %c0_26, %c0_27] : memref<10x2x8x256xf32, #tpu.memory_space<vmem>>, vector<1x1x8x256xf32>
    %20 = vector.shape_cast %19 : vector<1x1x8x256xf32> to vector<8x256xf32>
    %21 = arith.mulf %18, %20 : vector<8x256xf32>
    %22 = arith.addf %16, %21 : vector<8x256xf32>
    %c4 = arith.constant 4 : index
    %c0_28 = arith.constant 0 : index
    %c0_29 = arith.constant 0 : index
    %c0_30 = arith.constant 0 : index
    %23 = vector.load %arg1[%c4, %c0_28, %c0_29, %c0_30] : memref<10x2x8x256xf32, #tpu.memory_space<vmem>>, vector<1x1x8x256xf32>
    %24 = vector.shape_cast %23 : vector<1x1x8x256xf32> to vector<8x256xf32>
    %c4_31 = arith.constant 4 : index
    %c1_32 = arith.constant 1 : index
    %c0_33 = arith.constant 0 : index
    %c0_34 = arith.constant 0 : index
    %25 = vector.load %arg1[%c4_31, %c1_32, %c0_33, %c0_34] : memref<10x2x8x256xf32, #tpu.memory_space<vmem>>, vector<1x1x8x256xf32>
    %26 = vector.shape_cast %25 : vector<1x1x8x256xf32> to vector<8x256xf32>
    %27 = arith.mulf %24, %26 : vector<8x256xf32>
    %28 = arith.addf %22, %27 : vector<8x256xf32>
    %c5 = arith.constant 5 : index
    %c0_35 = arith.constant 0 : index
    %c0_36 = arith.constant 0 : index
    %c0_37 = arith.constant 0 : index
    %29 = vector.load %arg1[%c5, %c0_35, %c0_36, %c0_37] : memref<10x2x8x256xf32, #tpu.memory_space<vmem>>, vector<1x1x8x256xf32>
    %30 = vector.shape_cast %29 : vector<1x1x8x256xf32> to vector<8x256xf32>
    %c5_38 = arith.constant 5 : index
    %c1_39 = arith.constant 1 : index
    %c0_40 = arith.constant 0 : index
    %c0_41 = arith.constant 0 : index
    %31 = vector.load %arg1[%c5_38, %c1_39, %c0_40, %c0_41] : memref<10x2x8x256xf32, #tpu.memory_space<vmem>>, vector<1x1x8x256xf32>
    %32 = vector.shape_cast %31 : vector<1x1x8x256xf32> to vector<8x256xf32>
    %33 = arith.mulf %30, %32 : vector<8x256xf32>
    %34 = arith.addf %28, %33 : vector<8x256xf32>
    %c6 = arith.constant 6 : index
    %c0_42 = arith.constant 0 : index
    %c0_43 = arith.constant 0 : index
    %c0_44 = arith.constant 0 : index
    %35 = vector.load %arg1[%c6, %c0_42, %c0_43, %c0_44] : memref<10x2x8x256xf32, #tpu.memory_space<vmem>>, vector<1x1x8x256xf32>
    %36 = vector.shape_cast %35 : vector<1x1x8x256xf32> to vector<8x256xf32>
    %c6_45 = arith.constant 6 : index
    %c1_46 = arith.constant 1 : index
    %c0_47 = arith.constant 0 : index
    %c0_48 = arith.constant 0 : index
    %37 = vector.load %arg1[%c6_45, %c1_46, %c0_47, %c0_48] : memref<10x2x8x256xf32, #tpu.memory_space<vmem>>, vector<1x1x8x256xf32>
    %38 = vector.shape_cast %37 : vector<1x1x8x256xf32> to vector<8x256xf32>
    %39 = arith.mulf %36, %38 : vector<8x256xf32>
    %40 = arith.addf %34, %39 : vector<8x256xf32>
    %c7 = arith.constant 7 : index
    %c0_49 = arith.constant 0 : index
    %c0_50 = arith.constant 0 : index
    %c0_51 = arith.constant 0 : index
    %41 = vector.load %arg1[%c7, %c0_49, %c0_50, %c0_51] : memref<10x2x8x256xf32, #tpu.memory_space<vmem>>, vector<1x1x8x256xf32>
    %42 = vector.shape_cast %41 : vector<1x1x8x256xf32> to vector<8x256xf32>
    %c7_52 = arith.constant 7 : index
    %c1_53 = arith.constant 1 : index
    %c0_54 = arith.constant 0 : index
    %c0_55 = arith.constant 0 : index
    %43 = vector.load %arg1[%c7_52, %c1_53, %c0_54, %c0_55] : memref<10x2x8x256xf32, #tpu.memory_space<vmem>>, vector<1x1x8x256xf32>
    %44 = vector.shape_cast %43 : vector<1x1x8x256xf32> to vector<8x256xf32>
    %45 = arith.mulf %42, %44 : vector<8x256xf32>
    %46 = arith.addf %40, %45 : vector<8x256xf32>
    %c8 = arith.constant 8 : index
    %c0_56 = arith.constant 0 : index
    %c0_57 = arith.constant 0 : index
    %c0_58 = arith.constant 0 : index
    %47 = vector.load %arg1[%c8, %c0_56, %c0_57, %c0_58] : memref<10x2x8x256xf32, #tpu.memory_space<vmem>>, vector<1x1x8x256xf32>
    %48 = vector.shape_cast %47 : vector<1x1x8x256xf32> to vector<8x256xf32>
    %c8_59 = arith.constant 8 : index
    %c1_60 = arith.constant 1 : index
    %c0_61 = arith.constant 0 : index
    %c0_62 = arith.constant 0 : index
    %49 = vector.load %arg1[%c8_59, %c1_60, %c0_61, %c0_62] : memref<10x2x8x256xf32, #tpu.memory_space<vmem>>, vector<1x1x8x256xf32>
    %50 = vector.shape_cast %49 : vector<1x1x8x256xf32> to vector<8x256xf32>
    %51 = arith.mulf %48, %50 : vector<8x256xf32>
    %52 = arith.addf %46, %51 : vector<8x256xf32>
    %c9 = arith.constant 9 : index
    %c0_63 = arith.constant 0 : index
    %c0_64 = arith.constant 0 : index
    %c0_65 = arith.constant 0 : index
    %53 = vector.load %arg1[%c9, %c0_63, %c0_64, %c0_65] : memref<10x2x8x256xf32, #tpu.memory_space<vmem>>, vector<1x1x8x256xf32>
    %54 = vector.shape_cast %53 : vector<1x1x8x256xf32> to vector<8x256xf32>
    %c9_66 = arith.constant 9 : index
    %c1_67 = arith.constant 1 : index
    %c0_68 = arith.constant 0 : index
    %c0_69 = arith.constant 0 : index
    %55 = vector.load %arg1[%c9_66, %c1_67, %c0_68, %c0_69] : memref<10x2x8x256xf32, #tpu.memory_space<vmem>>, vector<1x1x8x256xf32>
    %56 = vector.shape_cast %55 : vector<1x1x8x256xf32> to vector<8x256xf32>
    %57 = arith.mulf %54, %56 : vector<8x256xf32>
    %58 = arith.addf %52, %57 : vector<8x256xf32>
    %cst = arith.constant 0.000000e+00 : f32
    %59 = vector.broadcast %cst : f32 to vector<8x256xf32>
    %60 = arith.maximumf %58, %59 : vector<8x256xf32>
    %c0_70 = arith.constant 0 : index
    %c0_71 = arith.constant 0 : index
    %61 = vector.load %arg2[%c0_70, %c0_71] : memref<256x32xf32, #tpu.memory_space<vmem>>, vector<256x32xf32>
    %cst_72 = arith.constant dense<0.000000e+00> : vector<8x32xf32>
    %62 = tpu.matmul %60, %61, %cst_72 {dimension_numbers = #tpu.dot_dimension_numbers<[1], [0], [0], [1], [0, 0, 1, 1], [], []>} : vector<8x256xf32>, vector<256x32xf32>, vector<8x32xf32> -> vector<8x32xf32>
    %c0_73 = arith.constant 0 : index
    %c0_74 = arith.constant 0 : index
    %63 = vector.load %arg3[%c0_73, %c0_74] : memref<1x32xf32, #tpu.memory_space<vmem>>, vector<1x32xf32>
    %64 = vector.broadcast %63 : vector<1x32xf32> to vector<8x32xf32>
    %65 = arith.addf %62, %64 : vector<8x32xf32>
    %cst_75 = arith.constant 0.000000e+00 : f32
    %66 = vector.broadcast %cst_75 : f32 to vector<8x32xf32>
    %67 = arith.maximumf %65, %66 : vector<8x32xf32>
    %c0_76 = arith.constant 0 : index
    %c0_77 = arith.constant 0 : index
    %68 = vector.load %arg4[%c0_76, %c0_77] : memref<32x256xf32, #tpu.memory_space<vmem>>, vector<32x256xf32>
    %cst_78 = arith.constant dense<0.000000e+00> : vector<8x256xf32>
    %69 = tpu.matmul %67, %68, %cst_78 {dimension_numbers = #tpu.dot_dimension_numbers<[1], [0], [0], [1], [0, 0, 1, 1], [], []>} : vector<8x32xf32>, vector<32x256xf32>, vector<8x256xf32> -> vector<8x256xf32>
    %c0_79 = arith.constant 0 : index
    %c0_80 = arith.constant 0 : index
    %70 = vector.load %arg5[%c0_79, %c0_80] : memref<1x256xf32, #tpu.memory_space<vmem>>, vector<1x256xf32>
    %71 = vector.broadcast %70 : vector<1x256xf32> to vector<8x256xf32>
    %72 = arith.addf %69, %71 : vector<8x256xf32>
    %c0_81 = arith.constant 0 : index
    %c0_82 = arith.constant 0 : index
    %73 = vector.load %arg6[%c0_81, %c0_82] : memref<8x256xf32, #tpu.memory_space<vmem>>, vector<8x256xf32>
    tpu.vector_store %arg6[%c0_81, %c0_82], %72 {strides = array<i32>} : memref<8x256xf32, #tpu.memory_space<vmem>>, vector<8x256xf32>,
    return
  }
  func.func @transform_0(%arg0: i32) -> (i32, i32, i32, i32) {
    %c0_i32 = arith.constant 0 : i32
    %c0_i32_0 = arith.constant 0 : i32
    %c0_i32_1 = arith.constant 0 : i32
    %c0_i32_2 = arith.constant 0 : i32
    %c0_i32_3 = arith.constant 0 : i32
    return %c0_i32, %c0_i32_0, %c0_i32_1, %c0_i32_2 : i32, i32, i32, i32
  }
  func.func @transform_1(%arg0: i32) -> (i32, i32) {
    %c0_i32 = arith.constant 0 : i32
    %c0_i32_0 = arith.constant 0 : i32
    %c0_i32_1 = arith.constant 0 : i32
    return %c0_i32, %c0_i32_0 : i32, i32
  }
  func.func @transform_2(%arg0: i32) -> (i32, i32) {
    %c0_i32 = arith.constant 0 : i32
    %c0_i32_0 = arith.constant 0 : i32
    %c0_i32_1 = arith.constant 0 : i32
    return %c0_i32, %c0_i32_0 : i32, i32
  }
  func.func @transform_3(%arg0: i32) -> (i32, i32) {
    %c0_i32 = arith.constant 0 : i32
    %c0_i32_0 = arith.constant 0 : i32
    %c0_i32_1 = arith.constant 0 : i32
    return %c0_i32, %c0_i32_0 : i32, i32
  }
  func.func @transform_4(%arg0: i32) -> (i32, i32) {
    %c0_i32 = arith.constant 0 : i32
    %c0_i32_0 = arith.constant 0 : i32
    %c0_i32_1 = arith.constant 0 : i32
    return %c0_i32, %c0_i32_0 : i32, i32
  }
  func.func @transform_5(%arg0: i32) -> (i32, i32) {
    %c0_i32 = arith.constant 0 : i32
    %c0_i32_0 = arith.constant 0 : i32
    %c0_i32_1 = arith.constant 0 : i32
    return %c0_i32, %c0_i32_0 : i32, i32
  }
}

</mosaic_0001>

<bundles_post_ra>
// kernel: tile.9
= control target key start
LH: loop header
LB: loop body
LE: loop exit
PB: predicated region body
PF: predicated region fallthrough
CT: control target
= control target key end

     0   :  { %s1252_s22 = smov 3  ;;  %vm362_vm0 = vcmask 523264   ;;  %s1254_s23 = smov 3  ;;  %vm794_vm1 = vcmask 1047556   ;;  %vm798_vm2 = vcmask 1048064   ;;  %s1882_s0 = inlined_call_operand.vmem [shape: f32[9,8,4,64], index: 0, kind: input, shape index: {}]   ;;  %s1883_s1 = inlined_call_operand.vmem [shape: f32[9,8,256], index: 1, kind: output, shape index: {}]  }
   0x1   :  { %v1121_v0 = vld [vmem:[%s1882_s0 + $0x1c] sm:$0xf]  ;;  %v1122_v1 = vld [vmem:[%s1882_s0 + $0x18] sm:$0xf]  ;;  %v1123_v2 = vld [vmem:[%s1882_s0 + $0x14] sm:$0xf] }
   0x2   :  { %328 = vst [vmem:[#allocation0 + $0x38] sm:$0xf] %v1121_v0  ;;  %333 = vst [vmem:[#allocation0 + $0x30] sm:$0xf] %v1122_v1  ;;  %v1124_v3 = vld [vmem:[%s1882_s0 + $0x10] sm:$0xf] }
   0x3   :  { %338 = vst [vmem:[#allocation0 + $0x28] sm:$0xf] %v1123_v2  ;;  %v1125_v4 = vld [vmem:[%s1882_s0 + $0xc] sm:$0xf]  ;;  %v1126_v5 = vld [vmem:[%s1882_s0 + $0x8] sm:$0xf] }
   0x4   :  { %343 = vst [vmem:[#allocation0 + $0x20] sm:$0xf] %v1124_v3  ;;  %348 = vst [vmem:[#allocation0 + $0x18] sm:$0xf] %v1125_v4  ;;  %v1127_v6 = vld [vmem:[%s1882_s0 + $0x4] sm:$0xf] }
   0x5   :  { %353 = vst [vmem:[#allocation0 + $0x10] sm:$0xf] %v1126_v5  ;;  %v358_v7 = vld [vmem:[%s1882_s0] sm:$0xf]  ;;  %357 = vst [vmem:[#allocation0 + $0x8] sm:$0xf] %v1127_v6 }
   0x6   :  { %359 = vst [vmem:[#allocation0] sm:$0xf] %v358_v7  ;;  %s1256_s24 = smov 3  ;;  %v1120_v8 = vld [vmem:[%s1882_s0 + $0x20] sm:$0xf]  ;;  %s377_s27 = smov 3 }
   0x7   :  { %s383_s28 = smov 3  ;;  %323 = vst [vmem:[#allocation0 + $0x40] sm:$0xf] %v1120_v8  ;;  %v1089_v9 = vld [vmem:[%s1882_s0 + $0x9c] sm:$0xf]  ;;  %s389_s4 = smov 3 }
   0x8   :  { %v1090_v10 = vld [vmem:[%s1882_s0 + $0x98] sm:$0xf]  ;;  %s395_s5 = smov 3  ;;  %168 = vst [vmem:[#allocation0 + $0x138] sm:$0xf] %v1089_v9  ;;  %s1273_s10 = smov 3 }
   0x9   :  { %173 = vst [vmem:[#allocation0 + $0x130] sm:$0xf] %v1090_v10  ;;  %v1091_v11 = vld [vmem:[%s1882_s0 + $0x94] sm:$0xf]  ;;  %v1092_v12 = vld [vmem:[%s1882_s0 + $0x90] sm:$0xf] }
   0xa   :  { %178 = vst [vmem:[#allocation0 + $0x128] sm:$0xf] %v1091_v11  ;;  %183 = vst [vmem:[#allocation0 + $0x120] sm:$0xf] %v1092_v12  ;;  %v1093_v13 = vld [vmem:[%s1882_s0 + $0x8c] sm:$0xf] }
   0xb   :  { %v1094_v14 = vld [vmem:[%s1882_s0 + $0x88] sm:$0xf]  ;;  %188 = vst [vmem:[#allocation0 + $0x118] sm:$0xf] %v1093_v13  ;;  %v1095_v15 = vld [vmem:[%s1882_s0 + $0x84] sm:$0xf] }
   0xc   :  { %193 = vst [vmem:[#allocation0 + $0x110] sm:$0xf] %v1094_v14  ;;  %v1096_v16 = vld [vmem:[%s1882_s0 + $0x80] sm:$0xf]  ;;  %v1097_v17 = vld [vmem:[%s1882_s0 + $0x7c] sm:$0xf] }
   0xd   :  { %v390_v18 = vld [vmem:[#allocation0 + $0x28] ss:$2 sm:%s389_s4]   ;;  %198 = vst [vmem:[#allocation0 + $0x108] sm:$0xf] %v1095_v15  ;;  %203 = vst [vmem:[#allocation0 + $0x100] sm:$0xf] %v1096_v16 }
   0xe   :  { %v396_v19 = vld [vmem:[#allocation0 + $0x30] ss:$2 sm:%s395_s5]   ;;  %208 = vst [vmem:[#allocation0 + $0xf8] sm:$0xf] %v1097_v17  ;;  %s1290_s21 = smov 3  ;;  %s1292_s25 = smov 3 }
   0xf   :  { %v372_v20 = vld [vmem:[#allocation0 + $0x10] ss:$2 sm:%s1256_s24]   ;;  %v384_v22 = vld [vmem:[#allocation0 + $0x20] ss:$2 sm:%s383_s28]   ;;  %s557_s4 = smov 3  ;;  %s563_s5 = smov 3 }
  0x10   :  { %v378_v21 = vld [vmem:[#allocation0 + $0x18] ss:$2 sm:%s377_s27]   ;;  %1132 = vst.msk [vmem:[%s1883_s1 + $0x5] ss:$8 sm:$0x3] %vm362_vm0, %v390_v18   ;;  %s575_s11 = smov 3 }
  0x11   :  { %1133 = vst.msk [vmem:[%s1883_s1 + $0x6] ss:$8 sm:$0x3] %vm362_vm0, %v396_v19   ;;  %v361_v23 = vld [vmem:[#allocation0] ss:$2 sm:%s1252_s22]   ;;  %s1217_s14 = smov 64  }
  0x12   :  { %v366_v24 = vld [vmem:[#allocation0 + $0x8] ss:$2 sm:%s1254_s23]   ;;  %1129 = vst.msk [vmem:[%s1883_s1 + $0x2] ss:$8 sm:$0x3] %vm362_vm0, %v372_v20   ;;  %s581_s17 = smov 3 }
  0x13   :  { %1130 = vst.msk [vmem:[%s1883_s1 + $0x3] ss:$8 sm:$0x3] %vm362_vm0, %v378_v21   ;;  %1131 = vst.msk [vmem:[%s1883_s1 + $0x4] ss:$8 sm:$0x3] %vm362_vm0, %v384_v22  }
  0x14   :  { %363 = vst.msk [vmem:[%s1883_s1] ss:$8 sm:$0x3] %vm362_vm0, %v361_v23   ;;  %1128 = vst.msk [vmem:[%s1883_s1 + $0x1] ss:$8 sm:$0x3] %vm362_vm0, %v366_v24  }
  0x15   :  { %v791_v25 = vld [vmem:[#allocation0 + $0x1] ss:$8 sm:$0xf]   ;;  %v402_v28 = vld [vmem:[#allocation0 + $0x38] ss:$2 sm:%s1273_s10]   ;;  %s569_s10 = smov 3 }
  0x16   :  { %v793_v26 = vld [vmem:[#allocation0 + $0x1] ss:$8 sm:$0xf0]   ;;  %1134 = vst.msk [vmem:[%s1883_s1 + $0x7] ss:$8 sm:$0x3] %vm362_vm0, %v402_v28  }
  0x17   :  { %v795_v27 = vsel %vm794_vm1, %v793_v26, %v791_v25  ;;  %v1088_v29 = vld [vmem:[%s1882_s0 + $0xa0] sm:$0xf]  ;;  %s587_s18 = smov 3  ;;  %v1105_v31 = vld [vmem:[%s1882_s0 + $0x5c] sm:$0xf]  ;;  %s593_s6 = smov 3 }
  0x18   :  { %796 = vrot.lane.b32.xlu0 %v795_v27, %s1217_s14  ;;  %v576_v30 = vld [vmem:[#allocation0 + $0x120] ss:$2 sm:%s575_s11]   ;;  %163 = vst [vmem:[#allocation0 + $0x140] sm:$0xf] %v1088_v29  ;;  %v564_v32 = vld [vmem:[#allocation0 + $0x110] ss:$2 sm:%s563_s5]  }
  0x19   :  { %v570_v33 = vld [vmem:[#allocation0 + $0x118] ss:$2 sm:%s569_s10]   ;;  %1163 = vst.msk [vmem:[%s1883_s1 + $0x44] ss:$8 sm:$0x3] %vm362_vm0, %v576_v30   ;;  %s1375_s11 = smov 3 }
  0x1a   :  { %v582_v34 = vld [vmem:[#allocation0 + $0x128] ss:$2 sm:%s581_s17]   ;;  %248 = vst [vmem:[#allocation0 + $0xb8] sm:$0xf] %v1105_v31  ;;  %v546_v35 = vld [vmem:[#allocation0 + $0xf8] ss:$2 sm:%s1290_s21]  }
  0x1b   :  { %v552_v36 = vld [vmem:[#allocation0 + $0x100] ss:$2 sm:%s1292_s25]   ;;  %1161 = vst.msk [vmem:[%s1883_s1 + $0x42] ss:$8 sm:$0x3] %vm362_vm0, %v564_v32   ;;  %s653_s19 = smov 3 }
  0x1c   :  { %v558_v37 = vld [vmem:[#allocation0 + $0x108] ss:$2 sm:%s557_s4]   ;;  %1162 = vst.msk [vmem:[%s1883_s1 + $0x43] ss:$8 sm:$0x3] %vm362_vm0, %v570_v33   ;;  %s659_s26 = smov 3 }
  0x1d   :  { %1164 = vst.msk [vmem:[%s1883_s1 + $0x45] ss:$8 sm:$0x3] %vm362_vm0, %v582_v34   ;;  %1158 = vst.msk [vmem:[%s1883_s1 + $0x37] ss:$8 sm:$0x3] %vm362_vm0, %v546_v35  }
  0x1e   :  { %1159 = vst.msk [vmem:[%s1883_s1 + $0x40] ss:$8 sm:$0x3] %vm362_vm0, %v552_v36   ;;  %1160 = vst.msk [vmem:[%s1883_s1 + $0x41] ss:$8 sm:$0x3] %vm362_vm0, %v558_v37  }
  0x1f   :  { %v812_v38 = vld [vmem:[#allocation0 + $0x101] ss:$8 sm:$0xf]   ;;  %v588_v39 = vld [vmem:[#allocation0 + $0x130] ss:$2 sm:%s587_s18]   ;;  %s647_s18 = smov 3 }
  0x20   :  { %v814_v40 = vld [vmem:[#allocation0 + $0x101] ss:$8 sm:$0xf0]   ;;  %1165 = vst.msk [vmem:[%s1883_s1 + $0x46] ss:$8 sm:$0x3] %vm362_vm0, %v588_v39  }
  0x21   :  { %v1106_v41 = vld [vmem:[%s1882_s0 + $0x58] sm:$0xf]  ;;  %v816_v42 = vsel %vm794_vm1, %v814_v40, %v812_v38  ;;  %v1107_v43 = vld [vmem:[%s1882_s0 + $0x54] sm:$0xf]  ;;  %v1108_v44 = vld [vmem:[%s1882_s0 + $0x50] sm:$0xf] }
  0x22   :  { %253 = vst [vmem:[#allocation0 + $0xb0] sm:$0xf] %v1106_v41  ;;  %v1109_v45 = vld [vmem:[%s1882_s0 + $0x4c] sm:$0xf]  ;;  %817 = vrot.lane.b32.xlu1 %v816_v42, %s1217_s14  ;;  %258 = vst [vmem:[#allocation0 + $0xa8] sm:$0xf] %v1107_v43 }
  0x23   :  { %263 = vst [vmem:[#allocation0 + $0xa0] sm:$0xf] %v1108_v44  ;;  %268 = vst [vmem:[#allocation0 + $0x98] sm:$0xf] %v1109_v45  ;;  %v1110_v46 = vld [vmem:[%s1882_s0 + $0x48] sm:$0xf] }
  0x24   :  { %v1111_v47 = vld [vmem:[%s1882_s0 + $0x44] sm:$0xf]  ;;  %v1112_v48 = vld [vmem:[%s1882_s0 + $0x40] sm:$0xf]  ;;  %273 = vst [vmem:[#allocation0 + $0x90] sm:$0xf] %v1110_v46 }
  0x25   :  { %v594_v49 = vld [vmem:[#allocation0 + $0x138] ss:$2 sm:%s593_s6]   ;;  %278 = vst [vmem:[#allocation0 + $0x88] sm:$0xf] %v1111_v47  ;;  %283 = vst [vmem:[#allocation0 + $0x80] sm:$0xf] %v1112_v48 }
  0x26   :  { %v1073_v50 = vld [vmem:[%s1882_s0 + $0xdc] sm:$0xf]  ;;  %v1074_v51 = vld [vmem:[%s1882_s0 + $0xd8] sm:$0xf]  ;;  %v1075_v52 = vld [vmem:[%s1882_s0 + $0xd4] sm:$0xf] }
  0x27   :  { %1166 = vst.msk [vmem:[%s1883_s1 + $0x47] ss:$8 sm:$0x3] %vm362_vm0, %v594_v49   ;;  %88 = vst [vmem:[#allocation0 + $0x1b8] sm:$0xf] %v1073_v50  ;;  %s665_s21 = smov 3 }
  0x28   :  { %93 = vst [vmem:[#allocation0 + $0x1b0] sm:$0xf] %v1074_v51  ;;  %v1076_v53 = vld [vmem:[%s1882_s0 + $0xd0] sm:$0xf]  ;;  %v1077_v54 = vld [vmem:[%s1882_s0 + $0xcc] sm:$0xf] }
  0x29   :  { %98 = vst [vmem:[#allocation0 + $0x1a8] sm:$0xf] %v1075_v52  ;;  %103 = vst [vmem:[#allocation0 + $0x1a0] sm:$0xf] %v1076_v53  ;;  %v1078_v55 = vld [vmem:[%s1882_s0 + $0xc8] sm:$0xf] }
  0x2a   :  { %108 = vst [vmem:[#allocation0 + $0x198] sm:$0xf] %v1077_v54  ;;  %v1079_v56 = vld [vmem:[%s1882_s0 + $0xc4] sm:$0xf]  ;;  %v1080_v57 = vld [vmem:[%s1882_s0 + $0xc0] sm:$0xf] }
  0x2b   :  { %113 = vst [vmem:[#allocation0 + $0x190] sm:$0xf] %v1078_v55  ;;  %118 = vst [vmem:[#allocation0 + $0x188] sm:$0xf] %v1079_v56  ;;  %v1081_v58 = vld [vmem:[%s1882_s0 + $0xbc] sm:$0xf] }
  0x2c   :  { %123 = vst [vmem:[#allocation0 + $0x180] sm:$0xf] %v1080_v57  ;;  %v1072_v59 = vld [vmem:[%s1882_s0 + $0xe0] sm:$0xf]  ;;  %128 = vst [vmem:[#allocation0 + $0x178] sm:$0xf] %v1081_v58 }
  0x2d   :  { %83 = vst [vmem:[#allocation0 + $0x1c0] sm:$0xf] %v1072_v59  ;;  %s671_s25 = smov 3  ;;  %s677_s27 = smov 3  ;;  %v1057_v62 = vld [vmem:[%s1882_s0 + $0x11c] sm:$0xf] }
  0x2e   :  { %v803_v60 = vld [vmem:[#allocation0 + $0x81] ss:$8 sm:$0xf0]   ;;  %s683_s28 = smov 3  ;;  %s1431_s22 = smov 3 }
  0x2f   :  { %v801_v61 = vld [vmem:[#allocation0 + $0x81] ss:$8 sm:$0xf]   ;;  %s1436_s30 = smov 3  ;;  %v684_v0 = vld [vmem:[#allocation0 + $0x1b0] ss:$2 sm:%s683_s28]  }
  0x30   :  { %v805_v63 = vsel %vm794_vm1, %v803_v60, %v801_v61  ;;  %8 = vst [vmem:[#allocation0 + $0x238] sm:$0xf] %v1057_v62  ;;  %v1058_v1 = vld [vmem:[%s1882_s0 + $0x118] sm:$0xf]  ;;  %v1059_v2 = vld [vmem:[%s1882_s0 + $0x114] sm:$0xf] }
  0x31   :  { %806 = vrot.lane.b32.xlu0 %v805_v63, %s1217_s14  ;;  %v666_v3 = vld [vmem:[#allocation0 + $0x198] ss:$2 sm:%s665_s21]   ;;  %v678_v5 = vld [vmem:[#allocation0 + $0x1a8] ss:$2 sm:%s677_s27]   ;;  %13 = vst [vmem:[#allocation0 + $0x230] sm:$0xf] %v1058_v1 }
  0x32   :  { %v672_v4 = vld [vmem:[#allocation0 + $0x1a0] ss:$2 sm:%s671_s25]   ;;  %1181 = vst.msk [vmem:[%s1883_s1 + $0x66] ss:$8 sm:$0x3] %vm362_vm0, %v684_v0   ;;  %s455_s24 = smov 3 }
  0x33   :  { %18 = vst [vmem:[#allocation0 + $0x228] sm:$0xf] %v1059_v2  ;;  %v648_v6 = vld [vmem:[#allocation0 + $0x180] ss:$2 sm:%s647_s18]   ;;  %v660_v8 = vld [vmem:[#allocation0 + $0x190] ss:$2 sm:%s659_s26]  }
  0x34   :  { %v654_v7 = vld [vmem:[#allocation0 + $0x188] ss:$2 sm:%s653_s19]   ;;  %1178 = vst.msk [vmem:[%s1883_s1 + $0x63] ss:$8 sm:$0x3] %vm362_vm0, %v666_v3   ;;  %s461_s25 = smov 3 }
  0x35   :  { %1179 = vst.msk [vmem:[%s1883_s1 + $0x64] ss:$8 sm:$0x3] %vm362_vm0, %v672_v4   ;;  %1180 = vst.msk [vmem:[%s1883_s1 + $0x65] ss:$8 sm:$0x3] %vm362_vm0, %v678_v5  }
  0x36   :  { %v845_v9 = vld [vmem:[#allocation0 + $0x3] ss:$8 sm:$0xf]   ;;  %v642_v11 = vld [vmem:[#allocation0 + $0x178] ss:$2 sm:%s1375_s11]   ;;  %s467_s18 = smov 3 }
  0x37   :  { %v847_v10 = vld [vmem:[#allocation0 + $0x3] ss:$8 sm:$0xf0]   ;;  %1175 = vst.msk [vmem:[%s1883_s1 + $0x60] ss:$8 sm:$0x3] %vm362_vm0, %v648_v6  }
  0x38   :  { %1176 = vst.msk [vmem:[%s1883_s1 + $0x61] ss:$8 sm:$0x3] %vm362_vm0, %v654_v7   ;;  %1177 = vst.msk [vmem:[%s1883_s1 + $0x62] ss:$8 sm:$0x3] %vm362_vm0, %v660_v8   ;;  %v849_v22 = vsel %vm794_vm1, %v847_v10, %v845_v9 }
  0x39   :  { %v823_v12 = vld [vmem:[#allocation0 + $0x181] ss:$8 sm:$0xf]   ;;  %1174 = vst.msk [vmem:[%s1883_s1 + $0x57] ss:$8 sm:$0x3] %vm362_vm0, %v642_v11  }
  0x3a   :  { %v825_v13 = vld [vmem:[#allocation0 + $0x181] ss:$8 sm:$0xf0]   ;;  %v690_v14 = vld [vmem:[#allocation0 + $0x1b8] ss:$2 sm:%s1431_s22]   ;;  %s473_s19 = smov 3 }
  0x3b   :  { %v827_v15 = vsel %vm794_vm1, %v825_v13, %v823_v12  ;;  %1182 = vst.msk [vmem:[%s1883_s1 + $0x67] ss:$8 sm:$0x3] %vm362_vm0, %v690_v14   ;;  %v1060_v16 = vld [vmem:[%s1882_s0 + $0x110] sm:$0xf]  ;;  %s479_s20 = smov 3 }
  0x3c   :  { %v1061_v17 = vld [vmem:[%s1882_s0 + $0x10c] sm:$0xf]  ;;  %v1062_v18 = vld [vmem:[%s1882_s0 + $0x108] sm:$0xf]  ;;  %828 = vrot.lane.b32.xlu1 %v827_v15, %s1217_s14  ;;  %23 = vst [vmem:[#allocation0 + $0x220] sm:$0xf] %v1060_v16 }
  0x3d   :  { %28 = vst [vmem:[#allocation0 + $0x218] sm:$0xf] %v1061_v17  ;;  %33 = vst [vmem:[#allocation0 + $0x210] sm:$0xf] %v1062_v18  ;;  %v1063_v19 = vld [vmem:[%s1882_s0 + $0x104] sm:$0xf] }
  0x3e   :  { %v1064_v20 = vld [vmem:[%s1882_s0 + $0x100] sm:$0xf]  ;;  %38 = vst [vmem:[#allocation0 + $0x208] sm:$0xf] %v1063_v19  ;;  %v1113_v25 = vld [vmem:[%s1882_s0 + $0x3c] sm:$0xf] }
  0x3f   :  { %v1104_v21 = vld [vmem:[%s1882_s0 + $0x60] sm:$0xf]  ;;  %43 = vst [vmem:[#allocation0 + $0x200] sm:$0xf] %v1064_v20  ;;  %v462_v27 = vld [vmem:[#allocation0 + $0x88] ss:$2 sm:%s461_s25]  }
  0x40   :  { %v867_v23 = vld [vmem:[#allocation0 + $0x103] ss:$8 sm:$0xf]   ;;  %243 = vst [vmem:[#allocation0 + $0xc0] sm:$0xf] %v1104_v21  ;;  %850 = vrot.lane.b32.xlu1 %v849_v22, %s1217_s14  ;;  %s491_s28 = smov 3 }
  0x41   :  { %v869_v24 = vld [vmem:[#allocation0 + $0x103] ss:$8 sm:$0xf0]   ;;  %v456_v26 = vld [vmem:[#allocation0 + $0x80] ss:$2 sm:%s455_s24]   ;;  %s485_s24 = smov 3 }
  0x42   :  { %288 = vst [vmem:[#allocation0 + $0x78] sm:$0xf] %v1113_v25  ;;  %1143 = vst.msk [vmem:[%s1883_s1 + $0x20] ss:$8 sm:$0x3] %vm362_vm0, %v456_v26   ;;  %v871_v30 = vsel %vm794_vm1, %v869_v24, %v867_v23  ;;  %s497_s22 = smov 3 }
  0x43   :  { %1144 = vst.msk [vmem:[%s1883_s1 + $0x21] ss:$8 sm:$0x3] %vm362_vm0, %v462_v27   ;;  %v468_v28 = vld [vmem:[#allocation0 + $0x90] ss:$2 sm:%s467_s18]   ;;  %s1534_s4 = smov 3 }
  0x44   :  { %v474_v29 = vld [vmem:[#allocation0 + $0x98] ss:$2 sm:%s473_s19]   ;;  %1145 = vst.msk [vmem:[%s1883_s1 + $0x22] ss:$8 sm:$0x3] %vm362_vm0, %v468_v28   ;;  %s743_s9 = smov 3  ;;  %872 = vrot.lane.b32.xlu1 %v871_v30, %s1217_s14 }
  0x45   :  { %1146 = vst.msk [vmem:[%s1883_s1 + $0x23] ss:$8 sm:$0x3] %vm362_vm0, %v474_v29   ;;  %v480_v31 = vld [vmem:[#allocation0 + $0xa0] ss:$2 sm:%s479_s20]   ;;  %s749_s10 = smov 3 }
  0x46   :  { %v486_v32 = vld [vmem:[#allocation0 + $0xa8] ss:$2 sm:%s485_s24]   ;;  %1147 = vst.msk [vmem:[%s1883_s1 + $0x24] ss:$8 sm:$0x3] %vm362_vm0, %v480_v31   ;;  %s755_s15 = smov 3 }
  0x47   :  { %1148 = vst.msk [vmem:[%s1883_s1 + $0x25] ss:$8 sm:$0x3] %vm362_vm0, %v486_v32   ;;  %v492_v33 = vld [vmem:[#allocation0 + $0xb0] ss:$2 sm:%s491_s28]   ;;  %s761_s11 = smov 3 }
  0x48   :  { %v856_v34 = vld [vmem:[#allocation0 + $0x83] ss:$8 sm:$0xf]   ;;  %v836_v36 = vld [vmem:[#allocation0 + $0x201] ss:$8 sm:$0xf0]  }
  0x49   :  { %v858_v35 = vld [vmem:[#allocation0 + $0x83] ss:$8 sm:$0xf0]   ;;  %1149 = vst.msk [vmem:[%s1883_s1 + $0x26] ss:$8 sm:$0x3] %vm362_vm0, %v492_v33  }
  0x4a   :  { %v1065_v37 = vld [vmem:[%s1882_s0 + $0xfc] sm:$0xf]  ;;  %v834_v38 = vld [vmem:[#allocation0 + $0x201] ss:$8 sm:$0xf]   ;;  %v860_v46 = vsel %vm794_vm1, %v858_v35, %v856_v34  ;;  %s767_s27 = smov 3 }
  0x4b   :  { %v498_v39 = vld [vmem:[#allocation0 + $0xb8] ss:$2 sm:%s497_s22]   ;;  %48 = vst [vmem:[#allocation0 + $0x1f8] sm:$0xf] %v1065_v37  ;;  %v838_v40 = vsel %vm794_vm1, %v836_v36, %v834_v38  ;;  %v750_v42 = vld [vmem:[#allocation0 + $0x208] ss:$2 sm:%s749_s10]  }
  0x4c   :  { %1150 = vst.msk [vmem:[%s1883_s1 + $0x27] ss:$8 sm:$0x3] %vm362_vm0, %v498_v39   ;;  %v744_v41 = vld [vmem:[#allocation0 + $0x200] ss:$2 sm:%s743_s9]   ;;  %839 = vrot.lane.b32.xlu0 %v838_v40, %s1217_s14  ;;  %s773_s28 = smov 3 }
  0x4d   :  { %v450_v43 = vld [vmem:[#allocation0 + $0x78] ss:$2 sm:%s1436_s30]   ;;  %1191 = vst.msk [vmem:[%s1883_s1 + $0x80] ss:$8 sm:$0x3] %vm362_vm0, %v744_v41   ;;  %s779_s22 = smov 3 }
  0x4e   :  { %1192 = vst.msk [vmem:[%s1883_s1 + $0x81] ss:$8 sm:$0x3] %vm362_vm0, %v750_v42   ;;  %v756_v44 = vld [vmem:[#allocation0 + $0x210] ss:$2 sm:%s755_s15]   ;;  %s785_s23 = smov 3 }
  0x4f   :  { %v762_v45 = vld [vmem:[#allocation0 + $0x218] ss:$2 sm:%s761_s11]   ;;  %1142 = vst.msk [vmem:[%s1883_s1 + $0x17] ss:$8 sm:$0x3] %vm362_vm0, %v450_v43   ;;  %s1580_s6 = smov 3 }
  0x50   :  { %1193 = vst.msk [vmem:[%s1883_s1 + $0x82] ss:$8 sm:$0x3] %vm362_vm0, %v756_v44   ;;  %1194 = vst.msk [vmem:[%s1883_s1 + $0x83] ss:$8 sm:$0x3] %vm362_vm0, %v762_v45   ;;  %861 = vrot.lane.b32.xlu0 %v860_v46, %s1217_s14 }
  0x51   :  { %v889_v47 = vld [vmem:[#allocation0 + $0x203] ss:$8 sm:$0xf]   ;;  %v768_v48 = vld [vmem:[#allocation0 + $0x220] ss:$2 sm:%s767_s27]   ;;  %s1588_s9 = smov 3 }
  0x52   :  { %v774_v49 = vld [vmem:[#allocation0 + $0x228] ss:$2 sm:%s773_s28]   ;;  %1195 = vst.msk [vmem:[%s1883_s1 + $0x84] ss:$8 sm:$0x3] %vm362_vm0, %v768_v48   ;;  %s1596_s12 = smov 3 }
  0x53   :  { %1196 = vst.msk [vmem:[%s1883_s1 + $0x85] ss:$8 sm:$0x3] %vm362_vm0, %v774_v49   ;;  %v891_v50 = vld [vmem:[#allocation0 + $0x203] ss:$8 sm:$0xf0]  }
  0x54   :  { %v780_v51 = vld [vmem:[#allocation0 + $0x230] ss:$2 sm:%s779_s22]   ;;  %v893_v52 = vsel %vm794_vm1, %v891_v50, %v889_v47  ;;  %v878_v54 = vld [vmem:[#allocation0 + $0x183] ss:$8 sm:$0xf]   ;;  %s503_s13 = smov 3 }
  0x55   :  { %1197 = vst.msk [vmem:[%s1883_s1 + $0x86] ss:$8 sm:$0x3] %vm362_vm0, %v780_v51   ;;  %v786_v53 = vld [vmem:[#allocation0 + $0x238] ss:$2 sm:%s785_s23]   ;;  %894 = vrot.lane.b32.xlu1 %v893_v52, %s1217_s14  ;;  %s509_s15 = smov 3 }
  0x56   :  { %v738_v55 = vld [vmem:[#allocation0 + $0x1f8] ss:$2 sm:%s1534_s4]   ;;  %1198 = vst.msk [vmem:[%s1883_s1 + $0x87] ss:$8 sm:$0x3] %vm362_vm0, %v786_v53   ;;  %s515_s16 = smov 3 }
  0x57   :  { %v880_v56 = vld [vmem:[#allocation0 + $0x183] ss:$8 sm:$0xf0]   ;;  %1190 = vst.msk [vmem:[%s1883_s1 + $0x77] ss:$8 sm:$0x3] %vm362_vm0, %v738_v55  }
  0x58   :  { %v882_v57 = vsel %vm794_vm1, %v880_v56, %v878_v54  ;;  %v1098_v58 = vld [vmem:[%s1882_s0 + $0x78] sm:$0xf]  ;;  %v1099_v59 = vld [vmem:[%s1882_s0 + $0x74] sm:$0xf]  ;;  %v1100_v60 = vld [vmem:[%s1882_s0 + $0x70] sm:$0xf] }
  0x59   :  { %213 = vst [vmem:[#allocation0 + $0xf0] sm:$0xf] %v1098_v58  ;;  %218 = vst [vmem:[#allocation0 + $0xe8] sm:$0xf] %v1099_v59  ;;  %v1101_v61 = vld [vmem:[%s1882_s0 + $0x6c] sm:$0xf]  ;;  %883 = vrot.lane.b32.xlu0 %v882_v57, %s1217_s14 }
  0x5a   :  { %223 = vst [vmem:[#allocation0 + $0xe0] sm:$0xf] %v1100_v60  ;;  %v1102_v62 = vld [vmem:[%s1882_s0 + $0x68] sm:$0xf]  ;;  %v1103_v63 = vld [vmem:[%s1882_s0 + $0x64] sm:$0xf] }
  0x5b   :  { %228 = vst [vmem:[#allocation0 + $0xd8] sm:$0xf] %v1101_v61  ;;  %233 = vst [vmem:[#allocation0 + $0xd0] sm:$0xf] %v1102_v62  ;;  %v1114_v0 = vld [vmem:[%s1882_s0 + $0x38] sm:$0xf] }
  0x5c   :  { %238 = vst [vmem:[#allocation0 + $0xc8] sm:$0xf] %v1103_v63  ;;  %v1115_v1 = vld [vmem:[%s1882_s0 + $0x34] sm:$0xf]  ;;  %v1116_v2 = vld [vmem:[%s1882_s0 + $0x30] sm:$0xf] }
  0x5d   :  { %293 = vst [vmem:[#allocation0 + $0x70] sm:$0xf] %v1114_v0  ;;  %298 = vst [vmem:[#allocation0 + $0x68] sm:$0xf] %v1115_v1  ;;  %v1117_v3 = vld [vmem:[%s1882_s0 + $0x2c] sm:$0xf] }
  0x5e   :  { %303 = vst [vmem:[#allocation0 + $0x60] sm:$0xf] %v1116_v2  ;;  %v1118_v4 = vld [vmem:[%s1882_s0 + $0x28] sm:$0xf]  ;;  %v1119_v5 = vld [vmem:[%s1882_s0 + $0x24] sm:$0xf] }
  0x5f   :  { %308 = vst [vmem:[#allocation0 + $0x58] sm:$0xf] %v1117_v3  ;;  %313 = vst [vmem:[#allocation0 + $0x50] sm:$0xf] %v1118_v4  ;;  %v1066_v6 = vld [vmem:[%s1882_s0 + $0xf8] sm:$0xf] }
  0x60   :  { %318 = vst [vmem:[#allocation0 + $0x48] sm:$0xf] %v1119_v5  ;;  %v1067_v7 = vld [vmem:[%s1882_s0 + $0xf4] sm:$0xf]  ;;  %v1068_v8 = vld [vmem:[%s1882_s0 + $0xf0] sm:$0xf] }
  0x61   :  { %53 = vst [vmem:[#allocation0 + $0x1f0] sm:$0xf] %v1066_v6  ;;  %58 = vst [vmem:[#allocation0 + $0x1e8] sm:$0xf] %v1067_v7  ;;  %v1069_v9 = vld [vmem:[%s1882_s0 + $0xec] sm:$0xf] }
  0x62   :  { %63 = vst [vmem:[#allocation0 + $0x1e0] sm:$0xf] %v1068_v8  ;;  %v1070_v10 = vld [vmem:[%s1882_s0 + $0xe8] sm:$0xf]  ;;  %v1071_v11 = vld [vmem:[%s1882_s0 + $0xe4] sm:$0xf] }
  0x63   :  { %68 = vst [vmem:[#allocation0 + $0x1d8] sm:$0xf] %v1069_v9  ;;  %73 = vst [vmem:[#allocation0 + $0x1d0] sm:$0xf] %v1070_v10  ;;  %v1082_v12 = vld [vmem:[%s1882_s0 + $0xb8] sm:$0xf] }
  0x64   :  { %78 = vst [vmem:[#allocation0 + $0x1c8] sm:$0xf] %v1071_v11  ;;  %v1083_v13 = vld [vmem:[%s1882_s0 + $0xb4] sm:$0xf]  ;;  %v1084_v14 = vld [vmem:[%s1882_s0 + $0xb0] sm:$0xf] }
  0x65   :  { %133 = vst [vmem:[#allocation0 + $0x170] sm:$0xf] %v1082_v12  ;;  %138 = vst [vmem:[#allocation0 + $0x168] sm:$0xf] %v1083_v13  ;;  %v1085_v15 = vld [vmem:[%s1882_s0 + $0xac] sm:$0xf] }
  0x66   :  { %143 = vst [vmem:[#allocation0 + $0x160] sm:$0xf] %v1084_v14  ;;  %v1086_v16 = vld [vmem:[%s1882_s0 + $0xa8] sm:$0xf]  ;;  %v1087_v17 = vld [vmem:[%s1882_s0 + $0xa4] sm:$0xf] }
  0x67   :  { %v913_v18 = vld [vmem:[#allocation0 + $0xc1] ss:$8 sm:$0xf0]   ;;  %148 = vst [vmem:[#allocation0 + $0x158] sm:$0xf] %v1085_v15  ;;  %s1676_s0 = smov 3 }
  0x68   :  { %153 = vst [vmem:[#allocation0 + $0x150] sm:$0xf] %v1086_v16  ;;  %158 = vst [vmem:[#allocation0 + $0x148] sm:$0xf] %v1087_v17  ;;  %v504_v20 = vld [vmem:[#allocation0 + $0xc0] ss:$2 sm:%s503_s13]  }
  0x69   :  { %v911_v19 = vld [vmem:[#allocation0 + $0xc1] ss:$8 sm:$0xf]   ;;  %1151 = vst.msk [vmem:[%s1883_s1 + $0x30] ss:$8 sm:$0x3] %vm362_vm0, %v504_v20  }
  0x6a   :  { %v915_v21 = vsel %vm794_vm1, %v913_v18, %v911_v19  ;;  %v902_v22 = vld [vmem:[#allocation0 + $0x41] ss:$8 sm:$0xf0]   ;;  %v510_v23 = vld [vmem:[#allocation0 + $0xc8] ss:$2 sm:%s509_s15]   ;;  %s521_s19 = smov 3 }
  0x6b   :  { %916 = vrot.lane.b32.xlu1 %v915_v21, %s1217_s14  ;;  %v900_v24 = vld [vmem:[#allocation0 + $0x41] ss:$8 sm:$0xf]   ;;  %1152 = vst.msk [vmem:[%s1883_s1 + $0x31] ss:$8 sm:$0x3] %vm362_vm0, %v510_v23  }
  0x6c   :  { %v516_v25 = vld [vmem:[#allocation0 + $0xd0] ss:$2 sm:%s515_s16]   ;;  %v904_v26 = vsel %vm794_vm1, %v902_v22, %v900_v24  ;;  %v935_v27 = vld [vmem:[#allocation0 + $0x1c1] ss:$8 sm:$0xf0]   ;;  %s527_s26 = smov 3 }
  0x6d   :  { %1153 = vst.msk [vmem:[%s1883_s1 + $0x32] ss:$8 sm:$0x3] %vm362_vm0, %v516_v25   ;;  %v522_v28 = vld [vmem:[#allocation0 + $0xd8] ss:$2 sm:%s521_s19]   ;;  %905 = vrot.lane.b32.xlu0 %v904_v26, %s1217_s14  ;;  %s533_s27 = smov 3 }
  0x6e   :  { %v933_v29 = vld [vmem:[#allocation0 + $0x1c1] ss:$8 sm:$0xf]   ;;  %1154 = vst.msk [vmem:[%s1883_s1 + $0x33] ss:$8 sm:$0x3] %vm362_vm0, %v522_v28  }
  0x6f   :  { %v528_v30 = vld [vmem:[#allocation0 + $0xe0] ss:$2 sm:%s527_s26]   ;;  %v937_v31 = vsel %vm794_vm1, %v935_v27, %v933_v29  ;;  %v924_v32 = vld [vmem:[#allocation0 + $0x141] ss:$8 sm:$0xf0]   ;;  %s539_s23 = smov 3 }
  0x70   :  { %1155 = vst.msk [vmem:[%s1883_s1 + $0x34] ss:$8 sm:$0x3] %vm362_vm0, %v528_v30   ;;  %v534_v33 = vld [vmem:[#allocation0 + $0xe8] ss:$2 sm:%s533_s27]   ;;  %938 = vrot.lane.b32.xlu1 %v937_v31, %s1217_s14  ;;  %s407_s8 = smov 3 }
  0x71   :  { %v600_v34 = vld [vmem:[#allocation0 + $0x140] ss:$2 sm:%s1580_s6]   ;;  %v612_v36 = vld [vmem:[#allocation0 + $0x150] ss:$2 sm:%s1596_s12]   ;;  %s419_s11 = smov 3  ;;  %s425_s17 = smov 3 }
  0x72   :  { %v606_v35 = vld [vmem:[#allocation0 + $0x148] ss:$2 sm:%s1588_s9]   ;;  %1156 = vst.msk [vmem:[%s1883_s1 + $0x35] ss:$8 sm:$0x3] %vm362_vm0, %v534_v33   ;;  %s431_s18 = smov 3 }
  0x73   :  { %1167 = vst.msk [vmem:[%s1883_s1 + $0x50] ss:$8 sm:$0x3] %vm362_vm0, %v600_v34   ;;  %1168 = vst.msk [vmem:[%s1883_s1 + $0x51] ss:$8 sm:$0x3] %vm362_vm0, %v606_v35  }
  0x74   :  { %1169 = vst.msk [vmem:[%s1883_s1 + $0x52] ss:$8 sm:$0x3] %vm362_vm0, %v612_v36   ;;  %v618_v37 = vld [vmem:[#allocation0 + $0x158] ss:$2 sm:%s1676_s0]   ;;  %s413_s0 = smov 3 }
  0x75   :  { %v922_v38 = vld [vmem:[#allocation0 + $0x141] ss:$8 sm:$0xf]   ;;  %1170 = vst.msk [vmem:[%s1883_s1 + $0x53] ss:$8 sm:$0x3] %vm362_vm0, %v618_v37  }
  0x76   :  { %v926_v39 = vsel %vm794_vm1, %v924_v32, %v922_v38  ;;  %v540_v40 = vld [vmem:[#allocation0 + $0xf0] ss:$2 sm:%s539_s23]   ;;  %v955_v41 = vld [vmem:[#allocation0 + $0xc3] ss:$8 sm:$0xf]   ;;  %s437_s21 = smov 3 }
  0x77   :  { %927 = vrot.lane.b32.xlu0 %v926_v39, %s1217_s14  ;;  %1157 = vst.msk [vmem:[%s1883_s1 + $0x36] ss:$8 sm:$0x3] %vm362_vm0, %v540_v40   ;;  %v957_v42 = vld [vmem:[#allocation0 + $0xc3] ss:$8 sm:$0xf0]  }
  0x78   :  { %v408_v43 = vld [vmem:[#allocation0 + $0x40] ss:$2 sm:%s407_s8]   ;;  %v959_v44 = vsel %vm794_vm1, %v957_v42, %v955_v41  ;;  %v420_v46 = vld [vmem:[#allocation0 + $0x50] ss:$2 sm:%s419_s11]   ;;  %s443_s25 = smov 3  ;;  %s695_s6 = smov 3 }
  0x79   :  { %1135 = vst.msk [vmem:[%s1883_s1 + $0x10] ss:$8 sm:$0x3] %vm362_vm0, %v408_v43   ;;  %v414_v45 = vld [vmem:[#allocation0 + $0x48] ss:$2 sm:%s413_s0]   ;;  %960 = vrot.lane.b32.xlu1 %v959_v44, %s1217_s14  ;;  %s701_s9 = smov 3 }
  0x7a   :  { %1136 = vst.msk [vmem:[%s1883_s1 + $0x11] ss:$8 sm:$0x3] %vm362_vm0, %v414_v45   ;;  %1137 = vst.msk [vmem:[%s1883_s1 + $0x12] ss:$8 sm:$0x3] %vm362_vm0, %v420_v46  }
  0x7b   :  { %v426_v47 = vld [vmem:[#allocation0 + $0x58] ss:$2 sm:%s425_s17]   ;;  %v438_v49 = vld [vmem:[#allocation0 + $0x68] ss:$2 sm:%s437_s21]   ;;  %s707_s5 = smov 3  ;;  %s713_s7 = smov 3 }
  0x7c   :  { %v432_v48 = vld [vmem:[#allocation0 + $0x60] ss:$2 sm:%s431_s18]   ;;  %1138 = vst.msk [vmem:[%s1883_s1 + $0x13] ss:$8 sm:$0x3] %vm362_vm0, %v426_v47   ;;  %s719_s13 = smov 3 }
  0x7d   :  { %1139 = vst.msk [vmem:[%s1883_s1 + $0x14] ss:$8 sm:$0x3] %vm362_vm0, %v432_v48   ;;  %v444_v50 = vld [vmem:[#allocation0 + $0x70] ss:$2 sm:%s443_s25]   ;;  %s725_s15 = smov 3 }
  0x7e   :  { %1140 = vst.msk [vmem:[%s1883_s1 + $0x15] ss:$8 sm:$0x3] %vm362_vm0, %v438_v49   ;;  %1141 = vst.msk [vmem:[%s1883_s1 + $0x16] ss:$8 sm:$0x3] %vm362_vm0, %v444_v50  }
  0x7f   :  { %v944_v51 = vld [vmem:[#allocation0 + $0x43] ss:$8 sm:$0xf]   ;;  %v696_v54 = vld [vmem:[#allocation0 + $0x1c0] ss:$2 sm:%s695_s6]   ;;  %s731_s18 = smov 3 }
  0x80   :  { %v946_v52 = vld [vmem:[#allocation0 + $0x43] ss:$8 sm:$0xf0]   ;;  %v702_v55 = vld [vmem:[#allocation0 + $0x1c8] ss:$2 sm:%s701_s9]   ;;  %s623_s19 = smov 3 }
  0x81   :  { %v948_v53 = vsel %vm794_vm1, %v946_v52, %v944_v51  ;;  %1183 = vst.msk [vmem:[%s1883_s1 + $0x70] ss:$8 sm:$0x3] %vm362_vm0, %v696_v54   ;;  %1184 = vst.msk [vmem:[%s1883_s1 + $0x71] ss:$8 sm:$0x3] %vm362_vm0, %v702_v55  }
  0x82   :  { %949 = vrot.lane.b32.xlu0 %v948_v53, %s1217_s14  ;;  %v708_v56 = vld [vmem:[#allocation0 + $0x1d0] ss:$2 sm:%s707_s5]   ;;  %v720_v58 = vld [vmem:[#allocation0 + $0x1e0] ss:$2 sm:%s719_s13]   ;;  %s629_s25 = smov 3  ;;  %s635_s22 = smov 3 }
  0x83   :  { %v714_v57 = vld [vmem:[#allocation0 + $0x1d8] ss:$2 sm:%s713_s7]   ;;  %1185 = vst.msk [vmem:[%s1883_s1 + $0x72] ss:$8 sm:$0x3] %vm362_vm0, %v708_v56  }
  0x84   :  { %1186 = vst.msk [vmem:[%s1883_s1 + $0x73] ss:$8 sm:$0x3] %vm362_vm0, %v714_v57   ;;  %v726_v59 = vld [vmem:[#allocation0 + $0x1e8] ss:$2 sm:%s725_s15]  }
  0x85   :  { %1187 = vst.msk [vmem:[%s1883_s1 + $0x74] ss:$8 sm:$0x3] %vm362_vm0, %v720_v58   ;;  %1188 = vst.msk [vmem:[%s1883_s1 + $0x75] ss:$8 sm:$0x3] %vm362_vm0, %v726_v59  }
  0x86   :  { %v732_v60 = vld [vmem:[#allocation0 + $0x1f0] ss:$2 sm:%s731_s18]   ;;  %v977_v61 = vld [vmem:[#allocation0 + $0x1c3] ss:$8 sm:$0xf]  }
  0x87   :  { %1189 = vst.msk [vmem:[%s1883_s1 + $0x76] ss:$8 sm:$0x3] %vm362_vm0, %v732_v60   ;;  %v979_v62 = vld [vmem:[#allocation0 + $0x1c3] ss:$8 sm:$0xf0]  }
  0x88   :  { %v624_v63 = vld [vmem:[#allocation0 + $0x160] ss:$2 sm:%s623_s19]   ;;  %v981_v0 = vsel %vm794_vm1, %v979_v62, %v977_v61  ;;  %v636_v2 = vld [vmem:[#allocation0 + $0x170] ss:$2 sm:%s635_s22]  }
  0x89   :  { %1171 = vst.msk [vmem:[%s1883_s1 + $0x54] ss:$8 sm:$0x3] %vm362_vm0, %v624_v63   ;;  %v630_v1 = vld [vmem:[#allocation0 + $0x168] ss:$2 sm:%s629_s25]   ;;  %982 = vrot.lane.b32.xlu1 %v981_v0, %s1217_s14 }
  0x8a   :  { %1172 = vst.msk [vmem:[%s1883_s1 + $0x55] ss:$8 sm:$0x3] %vm362_vm0, %v630_v1   ;;  %1173 = vst.msk [vmem:[%s1883_s1 + $0x56] ss:$8 sm:$0x3] %vm362_vm0, %v636_v2   ;;  %v797_v6 = vpop.permute.xlu0 %796  }
  0x8b   :  { %v966_v3 = vld [vmem:[#allocation0 + $0x143] ss:$8 sm:$0xf]   ;;  %799 = vst.msk [vmem:[%s1883_s1] sm:$0xff] %vm798_vm2, %v797_v6  }
  0x8c   :  { %v968_v4 = vld [vmem:[#allocation0 + $0x143] ss:$8 sm:$0xf0]  }
  0x8d   :  { %v970_v5 = vsel %vm794_vm1, %v968_v4, %v966_v3 }
  0x8e   :  { %971 = vrot.lane.b32.xlu0 %v970_v5, %s1217_s14 }
  0x94   :  { %v818_v7 = vpop.permute.xlu1 %817  }
  0x95   :  { %1200 = vst.msk [vmem:[%s1883_s1 + $0x40] sm:$0xff] %vm798_vm2, %v818_v7  }
  0xa3   :  { %v807_v8 = vpop.permute.xlu0 %806  }
  0xa4   :  { %1199 = vst.msk [vmem:[%s1883_s1 + $0x20] sm:$0xff] %vm798_vm2, %v807_v8  }
  0xae   :  { %v829_v9 = vpop.permute.xlu1 %828  }
  0xaf   :  { %1201 = vst.msk [vmem:[%s1883_s1 + $0x60] sm:$0xff] %vm798_vm2, %v829_v9  }
  0xb2   :  { %v851_v10 = vpop.permute.xlu1 %850  }
  0xb3   :  { %1203 = vst.msk [vmem:[%s1883_s1 + $0x8] sm:$0xff] %vm798_vm2, %v851_v10  }
  0xb6   :  { %v873_v11 = vpop.permute.xlu1 %872  }
  0xb7   :  { %1205 = vst.msk [vmem:[%s1883_s1 + $0x48] sm:$0xff] %vm798_vm2, %v873_v11  }
  0xbe   :  { %v840_v12 = vpop.permute.xlu0 %839  }
  0xbf   :  { %1202 = vst.msk [vmem:[%s1883_s1 + $0x80] sm:$0xff] %vm798_vm2, %v840_v12  }
  0xc2   :  { %v862_v13 = vpop.permute.xlu0 %861  }
  0xc3   :  { %1204 = vst.msk [vmem:[%s1883_s1 + $0x28] sm:$0xff] %vm798_vm2, %v862_v13  }
  0xc7   :  { %v895_v14 = vpop.permute.xlu1 %894  }
  0xc8   :  { %1207 = vst.msk [vmem:[%s1883_s1 + $0x88] sm:$0xff] %vm798_vm2, %v895_v14  }
  0xcb   :  { %v884_v15 = vpop.permute.xlu0 %883  }
  0xcc   :  { %1206 = vst.msk [vmem:[%s1883_s1 + $0x68] sm:$0xff] %vm798_vm2, %v884_v15  }
  0xdd   :  { %v917_v16 = vpop.permute.xlu1 %916  }
  0xde   :  { %1209 = vst.msk [vmem:[%s1883_s1 + $0x30] sm:$0xff] %vm798_vm2, %v917_v16  }
  0xdf   :  { %v906_v17 = vpop.permute.xlu0 %905  }
  0xe0   :  { %1208 = vst.msk [vmem:[%s1883_s1 + $0x10] sm:$0xff] %vm798_vm2, %v906_v17  }
  0xe2   :  { %v939_v18 = vpop.permute.xlu1 %938  }
  0xe3   :  { %1211 = vst.msk [vmem:[%s1883_s1 + $0x70] sm:$0xff] %vm798_vm2, %v939_v18  }
  0xe9   :  { %v928_v19 = vpop.permute.xlu0 %927  }
  0xea   :  { %1210 = vst.msk [vmem:[%s1883_s1 + $0x50] sm:$0xff] %vm798_vm2, %v928_v19  }
  0xeb   :  { %v961_v20 = vpop.permute.xlu1 %960  }
  0xec   :  { %1213 = vst.msk [vmem:[%s1883_s1 + $0x38] sm:$0xff] %vm798_vm2, %v961_v20  }
  0xf4   :  { %v950_v21 = vpop.permute.xlu0 %949  }
  0xf5   :  { %1212 = vst.msk [vmem:[%s1883_s1 + $0x18] sm:$0xff] %vm798_vm2, %v950_v21  }
  0xfb   :  { %v983_v22 = vpop.permute.xlu1 %982  }
  0xfc   :  { %1215 = vst.msk [vmem:[%s1883_s1 + $0x78] sm:$0xff] %vm798_vm2, %v983_v22  }
 0x100   :  { %v972_v23 = vpop.permute.xlu0 %971  }
 0x101   :  { %1214 = vst.msk [vmem:[%s1883_s1 + $0x58] sm:$0xff] %vm798_vm2, %v972_v23  }

// kernel: rel_interacte_forward.1
= control target key start
LH: loop header
LB: loop body
LE: loop exit
PB: predicated region body
PF: predicated region fallthrough
CT: control target
= control target key end

     0   :  { %s772_s0 = inlined_call_operand.vmem [shape: f32[10,2,8,256], index: 0, kind: input, shape index: {}]   ;;  %s773_s1 = inlined_call_operand.vmem [shape: f32[256,32], index: 1, kind: input, shape index: {}]   ;;  %s774_s2 = inlined_call_operand.vmem [shape: f32[1,32], index: 2, kind: input, shape index: {}]   ;;  %s775_s3 = inlined_call_operand.vmem [shape: f32[32,256], index: 3, kind: input, shape index: {}]   ;;  %s776_s4 = inlined_call_operand.vmem [shape: f32[1,256], index: 4, kind: input, shape index: {}]   ;;  %s777_s5 = inlined_call_operand.hbm [shape: f32[8,256], index: 5, kind: output, shape index: {}]  }
   0x1   :  { %v136_v0 = vld [vmem:[%s773_s1 + $0x80] sm:$0xff]  ;;  %v137_v1 = vld [vmem:[%s773_s1 + $0x88] sm:$0xff]  ;;  %v138_v5 = vld [vmem:[%s773_s1 + $0x90] sm:$0xff] }
   0x2   :  { %v120_v2 = vld [vmem:[%s773_s1] sm:$0xff]  ;;  %v416_v3 = vpack.c.bf16 %v137_v1, %v136_v0  ;;  %v121_v4 = vld [vmem:[%s773_s1 + $0x8] sm:$0xff]  ;;  %v139_v6 = vld [vmem:[%s773_s1 + $0x98] sm:$0xff] }
   0x3   :  { %v418_v7 = vpack.c.bf16 %v121_v4, %v120_v2  ;;  %v420_v8 = vpack.c.bf16 %v139_v6, %v138_v5  ;;  %v122_v9 = vld [vmem:[%s773_s1 + $0x10] sm:$0xff]  ;;  %v123_v10 = vld [vmem:[%s773_s1 + $0x18] sm:$0xff]  ;;  %v140_v11 = vld [vmem:[%s773_s1 + $0xa0] sm:$0xff] }
   0x4   :  { %417 = vmatprep.subr.bf16.mxu0 %v416_v3  ;;  %v141_v12 = vld [vmem:[%s773_s1 + $0xa8] sm:$0xff]  ;;  %v422_v13 = vpack.c.bf16 %v123_v10, %v122_v9  ;;  %v124_v15 = vld [vmem:[%s773_s1 + $0x20] sm:$0xff]  ;;  %v142_v17 = vld [vmem:[%s773_s1 + $0xb0] sm:$0xff] }
   0x5   :  { %419 = vmatpush3.bf16.msra.mxu0 %v418_v7  ;;  %v424_v14 = vpack.c.bf16 %v141_v12, %v140_v11  ;;  %v125_v16 = vld [vmem:[%s773_s1 + $0x28] sm:$0xff]  ;;  %v143_v18 = vld [vmem:[%s773_s1 + $0xb8] sm:$0xff]  ;;  %v126_v21 = vld [vmem:[%s773_s1 + $0x30] sm:$0xff] }
   0x6   :  { %421 = vmatprep.subr.bf16.mxu0 %v420_v8  ;;  %v426_v19 = vpack.c.bf16 %v125_v16, %v124_v15  ;;  %v428_v20 = vpack.c.bf16 %v143_v18, %v142_v17  ;;  %v127_v22 = vld [vmem:[%s773_s1 + $0x38] sm:$0xff]  ;;  %v144_v23 = vld [vmem:[%s773_s1 + $0xc0] sm:$0xff]  ;;  %v145_v24 = vld [vmem:[%s773_s1 + $0xc8] sm:$0xff] }
   0x7   :  { %v22_v25 = vld [vmem:[%s772_s0 + $0x8] sm:$0xff]  ;;  %v128_v26 = vld [vmem:[%s773_s1 + $0x40] sm:$0xff]  ;;  %v342_v28 = vld [vmem:[%s772_s0 + $0x18] sm:$0xff]  ;;  %v430_v31 = vpack.c.bf16 %v127_v22, %v126_v21  ;;  %v432_v37 = vpack.c.bf16 %v145_v24, %v144_v23 }
   0x8   :  { %v129_v27 = vld [vmem:[%s773_s1 + $0x48] sm:$0xff]  ;;  %v346_v30 = vld [vmem:[%s772_s0 + $0x38] sm:$0xff]  ;;  %v27_v32 = vmul.f32 %v342_v28, %v22_v25  ;;  %v146_v42 = vld [vmem:[%s773_s1 + $0xd0] sm:$0xff] }
   0x9   :  { %423 = vmatpush3.bf16.msra.mxu0 %v422_v13  ;;  %v344_v29 = vld [vmem:[%s772_s0 + $0x28] sm:$0xff]  ;;  %v350_v35 = vld [vmem:[%s772_s0 + $0x58] sm:$0xff]  ;;  %v130_v46 = vld [vmem:[%s773_s1 + $0x50] sm:$0xff]  ;;  %v434_v50 = vpack.c.bf16 %v129_v27, %v128_v26 }
   0xa   :  { %425 = vmatprep.subr.bf16.mxu0 %v424_v14  ;;  %v35_v33 = vmul.f32 %v346_v30, %v344_v29  ;;  %v348_v34 = vld [vmem:[%s772_s0 + $0x48] sm:$0xff]  ;;  %v354_v39 = vld [vmem:[%s772_s0 + $0x78] sm:$0xff]  ;;  %v148_v51 = vld [vmem:[%s773_s1 + $0xe0] sm:$0xff] }
   0xb   :  { %v352_v36 = vld [vmem:[%s772_s0 + $0x68] sm:$0xff]  ;;  %v45_v38 = vmul.f32 %v350_v35, %v348_v34  ;;  %v358_v41 = vld [vmem:[%s772_s0 + $0x98] sm:$0xff]  ;;  %v21_v60 = vld [vmem:[%s772_s0] sm:$0xff] }
   0xc   :  { %v356_v40 = vld [vmem:[%s772_s0 + $0x88] sm:$0xff]  ;;  %v147_v43 = vld [vmem:[%s773_s1 + $0xd8] sm:$0xff]  ;;  %v37_v44 = vadd.f32 %v35_v33, %v27_v32  ;;  %v55_v45 = vmul.f32 %v354_v39, %v352_v36  ;;  %v341_v61 = vld [vmem:[%s772_s0 + $0x10] sm:$0xff] }
   0xd   :  { %427 = vmatpush3.bf16.msra.mxu0 %v426_v19  ;;  %v131_v47 = vld [vmem:[%s773_s1 + $0x58] sm:$0xff]  ;;  %v360_v48 = vld [vmem:[%s772_s0 + $0xa8] sm:$0xff]  ;;  %v65_v54 = vmul.f32 %v358_v41, %v356_v40  ;;  %v436_v57 = vpack.c.bf16 %v147_v43, %v146_v42  ;;  %v26_v0 = vmul.f32 %v341_v61, %v21_v60  ;;  %v343_v1 = vld [vmem:[%s772_s0 + $0x20] sm:$0xff] }
   0xe   :  { %429 = vmatprep.subr.bf16.mxu0 %v428_v20  ;;  %v362_v49 = vld [vmem:[%s772_s0 + $0xb8] sm:$0xff]  ;;  %v149_v52 = vld [vmem:[%s773_s1 + $0xe8] sm:$0xff]  ;;  %v47_v53 = vadd.f32 %v45_v38, %v37_v44  ;;  %v345_v2 = vld [vmem:[%s772_s0 + $0x30] sm:$0xff]  ;;  %v438_v9 = vpack.c.bf16 %v131_v47, %v130_v46 }
   0xf   :  { %v364_v55 = vld [vmem:[%s772_s0 + $0xc8] sm:$0xff]  ;;  %v366_v56 = vld [vmem:[%s772_s0 + $0xd8] sm:$0xff]  ;;  %v75_v63 = vmul.f32 %v362_v49, %v360_v48  ;;  %v347_v3 = vld [vmem:[%s772_s0 + $0x40] sm:$0xff]  ;;  %v34_v5 = vmul.f32 %v345_v2, %v343_v1  ;;  %v440_v16 = vpack.c.bf16 %v149_v52, %v148_v51 }
  0x10   :  { %v368_v58 = vld [vmem:[%s772_s0 + $0xe8] sm:$0xff]  ;;  %v370_v59 = vld [vmem:[%s772_s0 + $0xf8] sm:$0xff]  ;;  %v57_v62 = vadd.f32 %v55_v45, %v47_v53  ;;  %v132_v4 = vld [vmem:[%s773_s1 + $0x60] sm:$0xff]  ;;  %v85_v12 = vmul.f32 %v366_v56, %v364_v55 }
  0x11   :  { %431 = vmatpush3.bf16.msra.mxu0 %v430_v31  ;;  %v349_v6 = vld [vmem:[%s772_s0 + $0x50] sm:$0xff]  ;;  %v351_v7 = vld [vmem:[%s772_s0 + $0x60] sm:$0xff]  ;;  %v133_v10 = vld [vmem:[%s773_s1 + $0x68] sm:$0xff]  ;;  %v36_v20 = vadd.f32 %v34_v5, %v26_v0  ;;  %v95_v24 = vmul.f32 %v370_v59, %v368_v58 }
  0x12   :  { %433 = vmatprep.subr.bf16.mxu0 %v432_v37  ;;  %v353_v8 = vld [vmem:[%s772_s0 + $0x70] sm:$0xff]  ;;  %v67_v11 = vadd.f32 %v65_v54, %v57_v62  ;;  %v44_v13 = vmul.f32 %v349_v6, %v347_v3  ;;  %v355_v14 = vld [vmem:[%s772_s0 + $0x80] sm:$0xff]  ;;  %v372_v18 = vld [vmem:[%s772_s0 + $0x108] sm:$0xff]  ;;  %v442_v31 = vpack.c.bf16 %v133_v10, %v132_v4 }
  0x13   :  { %v357_v15 = vld [vmem:[%s772_s0 + $0x90] sm:$0xff]  ;;  %v374_v19 = vld [vmem:[%s772_s0 + $0x118] sm:$0xff]  ;;  %v54_v21 = vmul.f32 %v353_v8, %v351_v7  ;;  %v359_v25 = vld [vmem:[%s772_s0 + $0xa0] sm:$0xff] }
  0x14   :  { %v150_v17 = vld [vmem:[%s773_s1 + $0xf0] sm:$0xff]  ;;  %v151_v22 = vld [vmem:[%s773_s1 + $0xf8] sm:$0xff]  ;;  %v77_v23 = vadd.f32 %v75_v63, %v67_v11  ;;  %v376_v27 = vld [vmem:[%s772_s0 + $0x128] sm:$0xff]  ;;  %v46_v29 = vadd.f32 %v44_v13, %v36_v20  ;;  %v64_v30 = vmul.f32 %v357_v15, %v355_v14  ;;  %v105_v33 = vmul.f32 %v374_v19, %v372_v18 }
  0x15   :  { %435 = vmatpush3.bf16.msra.mxu0 %v434_v50  ;;  %v361_v26 = vld [vmem:[%s772_s0 + $0xb0] sm:$0xff]  ;;  %v378_v28 = vld [vmem:[%s772_s0 + $0x138] sm:$0xff]  ;;  %v363_v34 = vld [vmem:[%s772_s0 + $0xc0] sm:$0xff] }
  0x16   :  { %437 = vmatprep.subr.bf16.mxu0 %v436_v57  ;;  %v87_v32 = vadd.f32 %v85_v12, %v77_v23  ;;  %v365_v35 = vld [vmem:[%s772_s0 + $0xd0] sm:$0xff] }
  0x19   :  { %439 = vmatpush3.bf16.msra.mxu0 %v438_v9 }
  0x1a   :  { %10 = vsyncpa [#allocation3], 0  ;;  %441 = vmatprep.subr.bf16.mxu0 %v440_v16  ;;  %v444_v36 = vpack.c.bf16 %v151_v22, %v150_v17  ;;  %v134_v37 = vld [vmem:[%s773_s1 + $0x70] sm:$0xff]  ;;  %v135_v38 = vld [vmem:[%s773_s1 + $0x78] sm:$0xff]  ;;  %v56_v39 = vadd.f32 %v54_v21, %v46_v29  ;;  %v74_v40 = vmul.f32 %v361_v26, %v359_v25  ;;  %v97_v41 = vadd.f32 %v95_v24, %v87_v32  ;;  %s483_s29 = smov [#allocation2]  }
  0x1b   :  { %v115_v42 = vmul.f32 %v378_v28, %v376_v27  ;;  %v367_v43 = vld [vmem:[%s772_s0 + $0xe0] sm:$0xff]  ;;  %v369_v44 = vld [vmem:[%s772_s0 + $0xf0] sm:$0xff]  ;;  %v84_v46 = vmul.f32 %v365_v35, %v363_v34  ;;  %v446_v47 = vpack.c.bf16 %v135_v38, %v134_v37  ;;  %v231_v0 = vld [vmem:[%s775_s3 + $0x8] sm:$0xff]  ;;  %v482_v12 = vmov 0.0   ;;  %s333_s30 = sshll.u32 %s483_s29, 4  ;;  %s334_s30 = int_to_ptr.vmem [resolvable:$true] %s333_s30 }
  0x1c   :  { %v66_v45 = vadd.f32 %v64_v30, %v56_v39  ;;  %v107_v48 = vadd.f32 %v105_v33, %v97_v41  ;;  %v371_v49 = vld [vmem:[%s772_s0 + $0x100] sm:$0xff]  ;;  %v373_v50 = vld [vmem:[%s772_s0 + $0x110] sm:$0xff]  ;;  %v94_v52 = vmul.f32 %v369_v44, %v367_v43  ;;  %v233_v1 = vld [vmem:[%s775_s3 + $0x18] sm:$0xff]  ;;  %318 = vmatprep.mubr.f32.mxu1 %v482_v12  ;;  %vm250_vm0 = vcmask 261120   ;;  %p463_p1 = scmp.lt.s32.totalorder %s334_s30, %s334_s30 }
  0x1d   :  { %443 = vmatpush3.bf16.msra.mxu0 %v442_v31  ;;  %v375_v54 = vld [vmem:[%s772_s0 + $0x120] sm:$0xff]  ;;  %v377_v55 = vld [vmem:[%s772_s0 + $0x130] sm:$0xff]  ;;  %v104_v57 = vmul.f32 %v373_v50, %v371_v49  ;;  %v448_v2 = vpack.c.bf16 %v233_v1, %v231_v0  ;;  %v235_v6 = vld [vmem:[%s775_s3 + $0x28] sm:$0xff]  ;;  %v240_v19 = vlaneseq }
  0x1e   :  { %445 = vmatprep.subr.bf16.mxu0 %v444_v36  ;;  %v76_v51 = vadd.f32 %v74_v40, %v66_v45  ;;  %v117_v53 = vadd.f32 %v115_v42, %v107_v48  ;;  %v114_v60 = vmul.f32 %v377_v55, %v375_v54  ;;  %v230_v3 = vld [vmem:[%s775_s3] sm:$0xff]  ;;  %v232_v4 = vld [vmem:[%s775_s3 + $0x10] sm:$0xff]  ;;  %v237_v7 = vld [vmem:[%s775_s3 + $0x38] sm:$0xff] }
  0x1f   :  { %v450_v5 = vpack.c.bf16 %v232_v4, %v230_v3  ;;  %449 = vmatprep.subr.bf16.mxu1 %v448_v2  ;;  %v452_v8 = vpack.c.bf16 %v237_v7, %v235_v6  ;;  %v234_v9 = vld [vmem:[%s775_s3 + $0x20] sm:$0xff]  ;;  %v236_v10 = vld [vmem:[%s775_s3 + $0x30] sm:$0xff]  ;;  %v241_v20 = vshrl.u32 %v240_v19, 7 }
  0x20   :  { %v86_v56 = vadd.f32 %v84_v46, %v76_v51  ;;  %v119_v58 = vmax.f32 %v117_v53, 0.0  ;;  %v454_v11 = vpack.c.bf16 %v236_v10, %v234_v9  ;;  %v379_v14 = vld [vmem:[%s774_s2] ss:$0 sm:$0xff]  ;;  %s458_s2 = scalar_lea.vmem %s334_s30, 256 }
  0x21   :  { %447 = vmatpush3.bf16.msra.mxu0 %v446_v47  ;;  %451 = vmatpush1.bf16.msra.mxu1 %v450_v5  ;;  %v242_v21 = vsub.s32 0, %v241_v20  ;;  %v238_v22 = vld [vmem:[%s776_s4] sm:$0x3]  ;;  %v246_v23 = vsub.s32 1, %v241_v20  ;;  %p459_p0 = scmp.ne.s32.totalorder %s334_s30, %s458_s2  ;;  %p464_p2 = scmp.lt.s32.totalorder %s458_s2, %s458_s2 }
  0x22   :  { %v96_v59 = vadd.f32 %v94_v52, %v86_v56  ;;  %223 = vmatprep.mubr.f32.mxu0 %v119_v58  ;;  %453 = vmatprep.subr.bf16.mxu1 %v452_v8 }
  0x23   :  { %v243_v24 = vrot.slane %v238_v22, %v242_v21  ;;  %v247_v25 = vrot.slane %v238_v22, %v246_v23  ;;  %p465_p3 = por %p464_p2, %p463_p1 }
  0x24   :  { %v106_v61 = vadd.f32 %v104_v57, %v96_v59 }
  0x25   :  { %455 = vmatpush1.bf16.msra.mxu1 %v454_v11  ;;  %p466_p4 = pnand %p465_p3, %p459_p0 }
  0x26   :  { %v116_v62 = vadd.f32 %v114_v60, %v106_v61 }
  0x28   :  { %v118_v63 = vmax.f32 %v116_v62, 0.0 }
  0x2a   :  { %224 = vmatmul.mubr.f32.vlgmr.msra.gmra.mrb[0].mxu0 %v118_v63 }
  0xfd   :  { %v413_v13 = vpop.f32.mrb[0].mxu0 }
  0xfe   :  { %v414_v15 = vpop.f32.mrb[1].mxu0 }
  0xff   :  { %v415_v16 = vadd.f32 %v414_v15, %v413_v13 }
 0x101   :  { %v226_v17 = vadd.f32 %v415_v16, %v379_v14 }
 0x103   :  { %v229_v18 = vmax.f32 %v226_v17, 0.0 }
 0x105   :  { %380 = vmatmul.mubr.msk.f32.vlgmr.msra.gmra.mrb[0].mxu1 %vm250_vm0, %v229_v18 }
 0x1d8   :  { %v320_v26 = vpop.f32.mrb[0].mxu1 }
 0x1d9   :  { %v321_v27 = vadd.f32 %v320_v26, %v243_v24  ;;  %v322_v28 = vpop.f32.mrb[1].mxu1 }
 0x1da   :  { %v323_v29 = vadd.f32 %v322_v28, %v247_v25 }
 0x1db   :  { %325 = vst [vmem:[#allocation2] sm:$0xff] %v321_v27 }
 0x1dc   :  { %326 = vst [vmem:[#allocation2 + $0x8] sm:$0xff] %v323_v29 }
 0x1dd   :  { %469 = shalt.err (!%p466_p4)
}
 0x1de   :  { %s470_s6 = scalar_lea.hbm %s777_s5, 256 }
 0x1df   :  { %p471_p5 = scmp.ne.s32.totalorder %s777_s5, %s470_s6  ;;  %p474_p6 = scmp.lt.u32.totalorder %s470_s6, %s777_s5 }
 0x1e1   :  { %p476_p7 = pnand %p474_p6, %p471_p5 }
 0x1e3   :  { %479 = shalt.err (!%p476_p7)
}
 0x1e4   :  { %336 = dma.vmem_to_hbm [thread:$0]  %s334_s30, 256, %s777_s5, [#allocation3]  }
 0x1e5   :  { %480 = dma.done.wait [#allocation3], 256  }
 0x1e6   :  { %481 = vsyncadd [#allocation3], 4294967040 }
 0x1e7   :  { %340 = vsyncpa [#allocation3], 1 }

</bundles_post_ra>
